<compile_context>
chip_gen: v6e
topology: v6e:2x2x1
jax: 0.10.0
libtpu: 0.0.40
codegen_flags: <defaults>
</compile_context>

<pallas_src>
import jax
import jax.numpy as jnp
from jax import lax
from jax.experimental import pallas as pl
from jax.experimental.pallas import tpu as pltpu


LANE = 128  # pad every channel axis to a multiple of 128 (lane-dense)


def _round_up(x, m):
    return (x + m - 1) // m * m


def _choose_group_tile(num_groups, nsample):
    """Groups per grid step: ~512 rows per block, multiple of 8 sublanes, and
    >=2 grid steps when enough groups exist so v7x's two TensorCores get work."""
    tg = max(8, (512 // max(nsample, 1)) // 8 * 8)
    if num_groups >= 16:
        tg = min(tg, max(8, (num_groups // 2) // 8 * 8))
    return min(tg, _round_up(num_groups, 8))


# --------------------------- Pallas kernel (hot path) ------------------------

def _make_sa_kernel(n_layers, nsample, tg, fuse_fc):
    """SA-module compute for one tile of `tg` groups.

    x_ref rows are sample-major inside the tile (row = s*tg + g), so the
    max-pool over samples is a chain of sublane-aligned (tg, C) slices.
    Shared MLP = folded-BN 1x1 convs: bf16 MXU matmul (f32 accum) + f32 bias
    + ReLU.  Optionally fuses the final Linear as an f32 epilogue.
    """

    def kernel(x_ref, *args):
        o_ref = args[-1]
        params = args[:-1]
        h = x_ref[...]                                    # (nsample*tg, C) bf16
        for l in range(n_layers):
            w = params[2 * l][...]                        # (C, C) bf16, BN scale folded in
            b = params[2 * l + 1][...]                    # (1, C) f32 BN bias
            acc = jnp.dot(h.astype(jnp.bfloat16), w,
                          preferred_element_type=jnp.float32)
            h = jnp.maximum(acc + b, 0.0)                 # bias + ReLU in f32
        # max-pool over the nsample axis (sample-major rows -> aligned slices)
        pooled = h[0:tg]
        for s in range(1, nsample):
            pooled = jnp.maximum(pooled, h[s * tg:(s + 1) * tg])
        if fuse_fc:                                       # fused final FC (kept f32)
            fw = params[2 * n_layers][...]
            fb = params[2 * n_layers + 1][...]
            pooled = jnp.dot(pooled, fw, preferred_element_type=jnp.float32) + fb
        o_ref[...] = pooled

    return kernel


def sa_mlp_maxpool(grouped, layer_params, fc_params=None):
    """grouped: (NO, G, S, Cpad) -> (NO, G, Cpad) f32 (optionally + fused FC).

    All NO*G groups share the MLP weights, so they are batched into large row
    tiles; each grid step does one big matmul per layer instead of a tiny
    per-object block.
    """
    NO, G, S, C = grouped.shape
    R = NO * G
    tg = _choose_group_tile(R, S)
    Rp = _round_up(R, tg)
    ntiles = Rp // tg

    x = grouped.reshape(R, S, C)
    if Rp != R:
        x = jnp.pad(x, ((0, Rp - R), (0, 0), (0, 0)))
    # wrapper-side layout plumbing: sample-major rows inside each tile so the
    # kernel never reshapes across (8,128) tile boundaries.
    x = (x.reshape(ntiles, tg, S, C).transpose(0, 2, 1, 3)
          .reshape(ntiles * S * tg, C)).astype(jnp.bfloat16)

    args = [x]
    in_specs = [pl.BlockSpec((S * tg, C), lambda i: (i, 0))]
    for w, b in layer_params:
        args += [w, b]
        in_specs += [pl.BlockSpec(w.shape, lambda i: (0, 0)),
                     pl.BlockSpec(b.shape, lambda i: (0, 0))]
    if fc_params is not None:
        fw, fb = fc_params
        args += [fw, fb]
        in_specs += [pl.BlockSpec(fw.shape, lambda i: (0, 0)),
                     pl.BlockSpec(fb.shape, lambda i: (0, 0))]

    kernel = _make_sa_kernel(len(layer_params), S, tg, fc_params is not None)
    out = pl.pallas_call(
        kernel,
        out_shape=jax.ShapeDtypeStruct((ntiles * tg, C), jnp.float32),
        grid=(ntiles,),
        in_specs=in_specs,
        out_specs=pl.BlockSpec((tg, C), lambda i: (i, 0)),
        compiler_params=pltpu.CompilerParams(
            dimension_semantics=("parallel",),
            vmem_limit_bytes=32 * 1024 * 1024),
    )(*args)
    return out[:R].reshape(NO, G, C)


# ----------------- JAX glue: sampling / grouping (data dependent) ------------
# TODO(synk): furthest-point-sampling / ball-query are data-dependent gathers;
# they (and the grouped-feature gather) stay in plain JAX.  Moving the gather
# into the kernel via scalar-prefetched index tables is the next step for
# realistic npoint/nsample.

def fps(xyz, npoint):
    """Furthest point sampling for one object. xyz: (N,3) -> (npoint,) indices.
    # TODO(synk): at realistic N this sequential loop dominates wall-clock."""
    N = xyz.shape[0]

    def body(i, state):
        idxs, dists = state
        last = xyz[idxs[i - 1]]
        d = jnp.sum((xyz - last) ** 2, axis=-1)
        dists = jnp.minimum(dists, d)
        idxs = idxs.at[i].set(jnp.argmax(dists).astype(jnp.int32))
        return idxs, dists

    idxs0 = jnp.zeros((npoint,), jnp.int32)
    dists0 = jnp.full((N,), 1e10, jnp.float32)
    idxs, _ = lax.fori_loop(1, npoint, body, (idxs0, dists0))
    return idxs


def ball_query(xyz, centers, radius, nsample):
    """xyz: (N,3), centers: (S,3) -> (S, nsample) neighbor indices."""
    N = xyz.shape[0]
    # pairwise squared distances via the matmul identity (MXU-friendly)
    x2 = jnp.sum(xyz * xyz, axis=-1)
    c2 = jnp.sum(centers * centers, axis=-1)
    d2 = jnp.maximum(c2[:, None] + x2[None, :] - 2.0 * centers @ xyz.T, 0.0)
    in_r = d2 < radius ** 2
    idx = jnp.where(in_r, jnp.arange(N, dtype=jnp.int32)[None, :], N)
    idx = jnp.sort(idx, axis=-1)[:, :nsample]
    first = idx[:, :1]
    idx = jnp.where(idx >= N, first, idx)  # pad with first in-radius index
    # NOTE: centers come from FPS (are actual points), so every center has at
    # least itself in radius; the clip below is only a safety net.
    idx = jnp.clip(idx, 0, N - 1)
    return idx.astype(jnp.int32)


def sample_and_group(xyz, feats, npoint, nsample, radius):
    """Per-object: FPS centers + ball-query grouping, use_xyz=True ordering."""
    idx_c = fps(xyz, npoint)
    centers = xyz[idx_c]                                  # (npoint, 3)
    idx_g = ball_query(xyz, centers, radius, nsample)     # (npoint, nsample)
    g_xyz = xyz[idx_g] - centers[:, None, :]              # recentered xyz
    g_feat = feats[idx_g]
    grouped = jnp.concatenate([g_xyz, g_feat], axis=-1)   # (npoint, nsample, 3+C)
    return centers, grouped


def _pad_channels(x, cpad):
    c = x.shape[-1]
    if c == cpad:
        return x
    return jnp.pad(x, [(0, 0)] * (x.ndim - 1) + [(0, cpad - c)])


# ------------------------------ Model forward --------------------------------

def pointnetpp_forward(pcds, params, config):
    """pcds: (NO, P, 6) -> (NO, feat_dim). Mirrors PointNetPP.forward."""
    xyz = pcds[..., :3]
    feats = pcds[..., 3:]
    levels = zip(config["sa_n_points"], config["sa_n_samples"], config["sa_radii"])
    for li, (npoint, nsample, radius) in enumerate(levels):
        layer_params = params["sa_packed"][li]
        cpad = params["sa_cpad"][li]
        if npoint is None:
            # GroupAll SA module (no recentering) with the final FC fused in.
            grouped = jnp.concatenate([xyz, feats], axis=-1)[:, None, :, :]
            grouped = _pad_channels(grouped, cpad)
            emb = sa_mlp_maxpool(grouped, layer_params,
                                 fc_params=(params["fc_w"], params["fc_b"]))
            # features.view(B, -1) + self.fc  (out_n_points == 1 for GroupAll)
            return emb[:, 0, :params["feat_dim"]]
        centers, grouped = jax.vmap(
            lambda x, f: sample_and_group(x, f, npoint, nsample, radius))(xyz, feats)
        grouped = _pad_channels(grouped, cpad)
        feats = sa_mlp_maxpool(grouped, layer_params)      # (NO, npoint, cpad)
        feats = feats[..., :config["sa_mlps"][li][-1]]     # back to real channels
        xyz = centers
    # TODO(synk): non-GroupAll final SA level (npoint*cout flatten before FC)
    # is not fused; config used here always ends with GroupAll.
    raise ValueError("last SA level must be GroupAll (sa_n_points[-1] is None)")


def pcd_obj_encoder_forward(obj_pcds, params, config):
    """obj_pcds: (B, num_objs, P, 6) -> (B, num_objs, feat_dim)."""
    B, O, P, C = obj_pcds.shape
    flat = obj_pcds.reshape(B * O, P, C)       # == loop over batch + stack
    emb = pointnetpp_forward(flat, params, config)
    emb = emb.reshape(B, O, -1)
    # nn.Dropout in eval mode is identity.
    # TODO(synk): training-mode dropout mask not implemented (inference semantics).
    return emb


# ------------------------------ Parameter init --------------------------------

def init_mlp_params(key, dims):
    weights, scales, biases = [], [], []
    for cin, cout in zip(dims[:-1], dims[1:]):
        key, k1, k2 = jax.random.split(key, 3)
        weights.append(jax.random.normal(k1, (cin, cout), jnp.float32)
                       * (1.0 / jnp.sqrt(float(cin))))
        scales.append(jnp.ones((1, cout), jnp.float32))    # BN gamma/sqrt(var+eps)@init
        biases.append(jax.random.normal(k2, (1, cout), jnp.float32) * 0.01)
    return weights, scales, biases


def _pack_sa_level(weights, scales, biases, cpad):
    """Fold BN scale into W, zero-pad channels to `cpad`, cast W to bf16."""
    packed = []
    for w, s, b in zip(weights, scales, biases):
        cin, cout = w.shape
        wf = w * s                                          # (x@w)*s == x@(w*s)
        wp = jnp.zeros((cpad, cpad), jnp.float32).at[:cin, :cout].set(wf)
        bp = jnp.zeros((1, cpad), jnp.float32).at[:, :cout].set(b)
        packed.append((wp.astype(jnp.bfloat16), bp))        # bias stays f32
    return packed


def init_params(key, config):
    sa_logical = []
    for mlp in config["sa_mlps"]:
        dims = [mlp[0] + 3] + list(mlp[1:])   # use_xyz=True adds 3 to input dim
        key, sub = jax.random.split(key)
        sa_logical.append(init_mlp_params(sub, dims))
    last = config["sa_mlps"][-1][-1]
    out_n_points = (config["sa_n_points"][-1]
                    if config["sa_n_points"][-1] is not None else 1)
    key, k1, k2 = jax.random.split(key, 3)
    fc_w = jax.random.normal(k1, (out_n_points * last, last), jnp.float32) \
        / jnp.sqrt(float(out_n_points * last))
    fc_b = jax.random.normal(k2, (1, last), jnp.float32) * 0.01

    sa_packed, cpads = [], []
    for w_l, s_l, b_l in sa_logical:
        dims = [w_l[0].shape[0]] + [w.shape[1] for w in w_l]
        cpad = _round_up(max(dims), LANE)
        cpads.append(cpad)
        sa_packed.append(_pack_sa_level(w_l, s_l, b_l, cpad))

    # final FC (kept f32), padded to the last level's channel width for fusion
    cpad = cpads[-1]
    assert fc_w.shape[0] <= cpad and fc_w.shape[1] <= cpad
    fc_w_pad = jnp.zeros((cpad, cpad), jnp.float32).at[:fc_w.shape[0], :fc_w.shape[1]].set(fc_w)
    fc_b_pad = jnp.zeros((1, cpad), jnp.float32).at[:, :fc_b.shape[1]].set(fc_b)
    return dict(sa_packed=sa_packed, sa_cpad=cpads,
                fc_w=fc_w_pad, fc_b=fc_b_pad, feat_dim=last)


# ------------------------------------ Main ------------------------------------

if __name__ == "__main__":
    config = dict(
        sa_n_points=[8, 4, None],
        sa_n_samples=[8, 4, None],
        sa_radii=[0.4, 0.8, None],
        sa_mlps=[[3, 16, 32], [32, 32, 64], [64, 64, 128]],
        dropout=0.1,
    )
    key = jax.random.PRNGKey(0)
    k_in, k_p = jax.random.split(key)
    # (batch=2, num_objs=4, num_points=16, 6 = xyz + rgb)
    obj_pcds = jax.random.uniform(k_in, (2, 4, 16, 6), jnp.float32)
    params = init_params(k_p, config)

    fwd = jax.jit(lambda x: pcd_obj_encoder_forward(x, params, config))
    out = fwd(obj_pcds)
    jax.block_until_ready(out)
    assert out.shape == (2, 4, 128), out.shape
    assert bool(jnp.all(jnp.isfinite(out)))
    print("KERNEL_OK")
</pallas_src>

<mosaic_0001>
module attributes {stable_mosaic.version = 11 : i64} {
  func.func @kernel(%arg0: i32, %arg1: memref<256x128xbf16, #tpu.memory_space<vmem>>, %arg2: memref<128x128xbf16, #tpu.memory_space<vmem>>, %arg3: memref<1x128xf32, #tpu.memory_space<vmem>>, %arg4: memref<128x128xbf16, #tpu.memory_space<vmem>>, %arg5: memref<1x128xf32, #tpu.memory_space<vmem>>, %arg6: memref<32x128xf32, #tpu.memory_space<vmem>>) attributes {dimension_semantics = [#tpu.dimension_semantics<parallel>], iteration_bounds = array<i64: 2>, scalar_prefetch = 0 : i64, scratch_operands = 0 : i64, tpu.core_type = #tpu.core_type<tc>, window_params = [{transform_indices = @transform_0, window_bounds = array<i64: 256, 128>}, {pipeline_mode = #tpu.pipeline_mode<synchronous>, transform_indices = @transform_1, window_bounds = array<i64: 128, 128>}, {pipeline_mode = #tpu.pipeline_mode<synchronous>, transform_indices = @transform_2, window_bounds = array<i64: 1, 128>}, {pipeline_mode = #tpu.pipeline_mode<synchronous>, transform_indices = @transform_3, window_bounds = array<i64: 128, 128>}, {pipeline_mode = #tpu.pipeline_mode<synchronous>, transform_indices = @transform_4, window_bounds = array<i64: 1, 128>}, {transform_indices = @transform_5, window_bounds = array<i64: 32, 128>}]} {
    %c0 = arith.constant 0 : index
    %c0_0 = arith.constant 0 : index
    %0 = vector.load %arg1[%c0, %c0_0] : memref<256x128xbf16, #tpu.memory_space<vmem>>, vector<256x128xbf16>
    %c0_1 = arith.constant 0 : index
    %c0_2 = arith.constant 0 : index
    %1 = vector.load %arg2[%c0_1, %c0_2] : memref<128x128xbf16, #tpu.memory_space<vmem>>, vector<128x128xbf16>
    %c0_3 = arith.constant 0 : index
    %c0_4 = arith.constant 0 : index
    %2 = vector.load %arg3[%c0_3, %c0_4] : memref<1x128xf32, #tpu.memory_space<vmem>>, vector<1x128xf32>
    %cst = arith.constant dense<0.000000e+00> : vector<256x128xf32>
    %3 = tpu.matmul %0, %1, %cst {dimension_numbers = #tpu.dot_dimension_numbers<[1], [0], [0], [1], [0, 0, 1, 1], [], []>} : vector<256x128xbf16>, vector<128x128xbf16>, vector<256x128xf32> -> vector<256x128xf32>
    %4 = vector.broadcast %2 : vector<1x128xf32> to vector<256x128xf32>
    %5 = arith.addf %3, %4 : vector<256x128xf32>
    %cst_5 = arith.constant 0.000000e+00 : f32
    %6 = vector.broadcast %cst_5 : f32 to vector<256x128xf32>
    %7 = arith.maximumf %5, %6 : vector<256x128xf32>
    %c0_6 = arith.constant 0 : index
    %c0_7 = arith.constant 0 : index
    %8 = vector.load %arg4[%c0_6, %c0_7] : memref<128x128xbf16, #tpu.memory_space<vmem>>, vector<128x128xbf16>
    %c0_8 = arith.constant 0 : index
    %c0_9 = arith.constant 0 : index
    %9 = vector.load %arg5[%c0_8, %c0_9] : memref<1x128xf32, #tpu.memory_space<vmem>>, vector<1x128xf32>
    %10 = arith.truncf %7 : vector<256x128xf32> to vector<256x128xbf16>
    %cst_10 = arith.constant dense<0.000000e+00> : vector<256x128xf32>
    %11 = tpu.matmul %10, %8, %cst_10 {dimension_numbers = #tpu.dot_dimension_numbers<[1], [0], [0], [1], [0, 0, 1, 1], [], []>} : vector<256x128xbf16>, vector<128x128xbf16>, vector<256x128xf32> -> vector<256x128xf32>
    %12 = vector.broadcast %9 : vector<1x128xf32> to vector<256x128xf32>
    %13 = arith.addf %11, %12 : vector<256x128xf32>
    %cst_11 = arith.constant 0.000000e+00 : f32
    %14 = vector.broadcast %cst_11 : f32 to vector<256x128xf32>
    %15 = arith.maximumf %13, %14 : vector<256x128xf32>
    %16 = vector.extract_strided_slice %15 {offsets = [0, 0], sizes = [32, 128], strides = [1, 1]} : vector<256x128xf32> to vector<32x128xf32>
    %17 = vector.extract_strided_slice %15 {offsets = [32, 0], sizes = [32, 128], strides = [1, 1]} : vector<256x128xf32> to vector<32x128xf32>
    %18 = arith.maximumf %16, %17 : vector<32x128xf32>
    %19 = vector.extract_strided_slice %15 {offsets = [64, 0], sizes = [32, 128], strides = [1, 1]} : vector<256x128xf32> to vector<32x128xf32>
    %20 = arith.maximumf %18, %19 : vector<32x128xf32>
    %21 = vector.extract_strided_slice %15 {offsets = [96, 0], sizes = [32, 128], strides = [1, 1]} : vector<256x128xf32> to vector<32x128xf32>
    %22 = arith.maximumf %20, %21 : vector<32x128xf32>
    %23 = vector.extract_strided_slice %15 {offsets = [128, 0], sizes = [32, 128], strides = [1, 1]} : vector<256x128xf32> to vector<32x128xf32>
    %24 = arith.maximumf %22, %23 : vector<32x128xf32>
    %25 = vector.extract_strided_slice %15 {offsets = [160, 0], sizes = [32, 128], strides = [1, 1]} : vector<256x128xf32> to vector<32x128xf32>
    %26 = arith.maximumf %24, %25 : vector<32x128xf32>
    %27 = vector.extract_strided_slice %15 {offsets = [192, 0], sizes = [32, 128], strides = [1, 1]} : vector<256x128xf32> to vector<32x128xf32>
    %28 = arith.maximumf %26, %27 : vector<32x128xf32>
    %29 = vector.extract_strided_slice %15 {offsets = [224, 0], sizes = [32, 128], strides = [1, 1]} : vector<256x128xf32> to vector<32x128xf32>
    %30 = arith.maximumf %28, %29 : vector<32x128xf32>
    %c0_12 = arith.constant 0 : index
    %c0_13 = arith.constant 0 : index
    %31 = vector.load %arg6[%c0_12, %c0_13] : memref<32x128xf32, #tpu.memory_space<vmem>>, vector<32x128xf32>
    tpu.vector_store %arg6[%c0_12, %c0_13], %30 {strides = array<i32>} : memref<32x128xf32, #tpu.memory_space<vmem>>, vector<32x128xf32>,
    return
  }
  func.func @transform_0(%arg0: i32) -> (i32, i32) {
    %c0_i32 = arith.constant 0 : i32
    %c0_i32_0 = arith.constant 0 : i32
    return %arg0, %c0_i32 : i32, i32
  }
  func.func @transform_1(%arg0: i32) -> (i32, i32) {
    %c0_i32 = arith.constant 0 : i32
    %c0_i32_0 = arith.constant 0 : i32
    %c0_i32_1 = arith.constant 0 : i32
    return %c0_i32, %c0_i32_0 : i32, i32
  }
  func.func @transform_2(%arg0: i32) -> (i32, i32) {
    %c0_i32 = arith.constant 0 : i32
    %c0_i32_0 = arith.constant 0 : i32
    %c0_i32_1 = arith.constant 0 : i32
    return %c0_i32, %c0_i32_0 : i32, i32
  }
  func.func @transform_3(%arg0: i32) -> (i32, i32) {
    %c0_i32 = arith.constant 0 : i32
    %c0_i32_0 = arith.constant 0 : i32
    %c0_i32_1 = arith.constant 0 : i32
    return %c0_i32, %c0_i32_0 : i32, i32
  }
  func.func @transform_4(%arg0: i32) -> (i32, i32) {
    %c0_i32 = arith.constant 0 : i32
    %c0_i32_0 = arith.constant 0 : i32
    %c0_i32_1 = arith.constant 0 : i32
    return %c0_i32, %c0_i32_0 : i32, i32
  }
  func.func @transform_5(%arg0: i32) -> (i32, i32) {
    %c0_i32 = arith.constant 0 : i32
    %c0_i32_0 = arith.constant 0 : i32
    return %arg0, %c0_i32 : i32, i32
  }
}

module attributes {stable_mosaic.version = 11 : i64} {
  func.func @kernel(%arg0: i32, %arg1: memref<64x128xbf16, #tpu.memory_space<vmem>>, %arg2: memref<128x128xbf16, #tpu.memory_space<vmem>>, %arg3: memref<1x128xf32, #tpu.memory_space<vmem>>, %arg4: memref<128x128xbf16, #tpu.memory_space<vmem>>, %arg5: memref<1x128xf32, #tpu.memory_space<vmem>>, %arg6: memref<16x128xf32, #tpu.memory_space<vmem>>) attributes {dimension_semantics = [#tpu.dimension_semantics<parallel>], iteration_bounds = array<i64: 2>, scalar_prefetch = 0 : i64, scratch_operands = 0 : i64, tpu.core_type = #tpu.core_type<tc>, window_params = [{transform_indices = @transform_0, window_bounds = array<i64: 64, 128>}, {pipeline_mode = #tpu.pipeline_mode<synchronous>, transform_indices = @transform_1, window_bounds = array<i64: 128, 128>}, {pipeline_mode = #tpu.pipeline_mode<synchronous>, transform_indices = @transform_2, window_bounds = array<i64: 1, 128>}, {pipeline_mode = #tpu.pipeline_mode<synchronous>, transform_indices = @transform_3, window_bounds = array<i64: 128, 128>}, {pipeline_mode = #tpu.pipeline_mode<synchronous>, transform_indices = @transform_4, window_bounds = array<i64: 1, 128>}, {transform_indices = @transform_5, window_bounds = array<i64: 16, 128>}]} {
    %c0 = arith.constant 0 : index
    %c0_0 = arith.constant 0 : index
    %0 = vector.load %arg1[%c0, %c0_0] : memref<64x128xbf16, #tpu.memory_space<vmem>>, vector<64x128xbf16>
    %c0_1 = arith.constant 0 : index
    %c0_2 = arith.constant 0 : index
    %1 = vector.load %arg2[%c0_1, %c0_2] : memref<128x128xbf16, #tpu.memory_space<vmem>>, vector<128x128xbf16>
    %c0_3 = arith.constant 0 : index
    %c0_4 = arith.constant 0 : index
    %2 = vector.load %arg3[%c0_3, %c0_4] : memref<1x128xf32, #tpu.memory_space<vmem>>, vector<1x128xf32>
    %cst = arith.constant dense<0.000000e+00> : vector<64x128xf32>
    %3 = tpu.matmul %0, %1, %cst {dimension_numbers = #tpu.dot_dimension_numbers<[1], [0], [0], [1], [0, 0, 1, 1], [], []>} : vector<64x128xbf16>, vector<128x128xbf16>, vector<64x128xf32> -> vector<64x128xf32>
    %4 = vector.broadcast %2 : vector<1x128xf32> to vector<64x128xf32>
    %5 = arith.addf %3, %4 : vector<64x128xf32>
    %cst_5 = arith.constant 0.000000e+00 : f32
    %6 = vector.broadcast %cst_5 : f32 to vector<64x128xf32>
    %7 = arith.maximumf %5, %6 : vector<64x128xf32>
    %c0_6 = arith.constant 0 : index
    %c0_7 = arith.constant 0 : index
    %8 = vector.load %arg4[%c0_6, %c0_7] : memref<128x128xbf16, #tpu.memory_space<vmem>>, vector<128x128xbf16>
    %c0_8 = arith.constant 0 : index
    %c0_9 = arith.constant 0 : index
    %9 = vector.load %arg5[%c0_8, %c0_9] : memref<1x128xf32, #tpu.memory_space<vmem>>, vector<1x128xf32>
    %10 = arith.truncf %7 : vector<64x128xf32> to vector<64x128xbf16>
    %cst_10 = arith.constant dense<0.000000e+00> : vector<64x128xf32>
    %11 = tpu.matmul %10, %8, %cst_10 {dimension_numbers = #tpu.dot_dimension_numbers<[1], [0], [0], [1], [0, 0, 1, 1], [], []>} : vector<64x128xbf16>, vector<128x128xbf16>, vector<64x128xf32> -> vector<64x128xf32>
    %12 = vector.broadcast %9 : vector<1x128xf32> to vector<64x128xf32>
    %13 = arith.addf %11, %12 : vector<64x128xf32>
    %cst_11 = arith.constant 0.000000e+00 : f32
    %14 = vector.broadcast %cst_11 : f32 to vector<64x128xf32>
    %15 = arith.maximumf %13, %14 : vector<64x128xf32>
    %16 = vector.extract_strided_slice %15 {offsets = [0, 0], sizes = [16, 128], strides = [1, 1]} : vector<64x128xf32> to vector<16x128xf32>
    %17 = vector.extract_strided_slice %15 {offsets = [16, 0], sizes = [16, 128], strides = [1, 1]} : vector<64x128xf32> to vector<16x128xf32>
    %18 = arith.maximumf %16, %17 : vector<16x128xf32>
    %19 = vector.extract_strided_slice %15 {offsets = [32, 0], sizes = [16, 128], strides = [1, 1]} : vector<64x128xf32> to vector<16x128xf32>
    %20 = arith.maximumf %18, %19 : vector<16x128xf32>
    %21 = vector.extract_strided_slice %15 {offsets = [48, 0], sizes = [16, 128], strides = [1, 1]} : vector<64x128xf32> to vector<16x128xf32>
    %22 = arith.maximumf %20, %21 : vector<16x128xf32>
    %c0_12 = arith.constant 0 : index
    %c0_13 = arith.constant 0 : index
    %23 = vector.load %arg6[%c0_12, %c0_13] : memref<16x128xf32, #tpu.memory_space<vmem>>, vector<16x128xf32>
    tpu.vector_store %arg6[%c0_12, %c0_13], %22 {strides = array<i32>} : memref<16x128xf32, #tpu.memory_space<vmem>>, vector<16x128xf32>,
    return
  }
  func.func @transform_0(%arg0: i32) -> (i32, i32) {
    %c0_i32 = arith.constant 0 : i32
    %c0_i32_0 = arith.constant 0 : i32
    return %arg0, %c0_i32 : i32, i32
  }
  func.func @transform_1(%arg0: i32) -> (i32, i32) {
    %c0_i32 = arith.constant 0 : i32
    %c0_i32_0 = arith.constant 0 : i32
    %c0_i32_1 = arith.constant 0 : i32
    return %c0_i32, %c0_i32_0 : i32, i32
  }
  func.func @transform_2(%arg0: i32) -> (i32, i32) {
    %c0_i32 = arith.constant 0 : i32
    %c0_i32_0 = arith.constant 0 : i32
    %c0_i32_1 = arith.constant 0 : i32
    return %c0_i32, %c0_i32_0 : i32, i32
  }
  func.func @transform_3(%arg0: i32) -> (i32, i32) {
    %c0_i32 = arith.constant 0 : i32
    %c0_i32_0 = arith.constant 0 : i32
    %c0_i32_1 = arith.constant 0 : i32
    return %c0_i32, %c0_i32_0 : i32, i32
  }
  func.func @transform_4(%arg0: i32) -> (i32, i32) {
    %c0_i32 = arith.constant 0 : i32
    %c0_i32_0 = arith.constant 0 : i32
    %c0_i32_1 = arith.constant 0 : i32
    return %c0_i32, %c0_i32_0 : i32, i32
  }
  func.func @transform_5(%arg0: i32) -> (i32, i32) {
    %c0_i32 = arith.constant 0 : i32
    %c0_i32_0 = arith.constant 0 : i32
    return %arg0, %c0_i32 : i32, i32
  }
}

module attributes {stable_mosaic.version = 11 : i64} {
  func.func @kernel(%arg0: i32, %arg1: memref<32x128xbf16, #tpu.memory_space<vmem>>, %arg2: memref<128x128xbf16, #tpu.memory_space<vmem>>, %arg3: memref<1x128xf32, #tpu.memory_space<vmem>>, %arg4: memref<128x128xbf16, #tpu.memory_space<vmem>>, %arg5: memref<1x128xf32, #tpu.memory_space<vmem>>, %arg6: memref<128x128xf32, #tpu.memory_space<vmem>>, %arg7: memref<1x128xf32, #tpu.memory_space<vmem>>, %arg8: memref<8x128xf32, #tpu.memory_space<vmem>>) attributes {dimension_semantics = [#tpu.dimension_semantics<parallel>], iteration_bounds = array<i64: 1>, scalar_prefetch = 0 : i64, scratch_operands = 0 : i64, tpu.core_type = #tpu.core_type<tc>, window_params = [{transform_indices = @transform_0, window_bounds = array<i64: 32, 128>}, {pipeline_mode = #tpu.pipeline_mode<synchronous>, transform_indices = @transform_1, window_bounds = array<i64: 128, 128>}, {pipeline_mode = #tpu.pipeline_mode<synchronous>, transform_indices = @transform_2, window_bounds = array<i64: 1, 128>}, {pipeline_mode = #tpu.pipeline_mode<synchronous>, transform_indices = @transform_3, window_bounds = array<i64: 128, 128>}, {pipeline_mode = #tpu.pipeline_mode<synchronous>, transform_indices = @transform_4, window_bounds = array<i64: 1, 128>}, {pipeline_mode = #tpu.pipeline_mode<synchronous>, transform_indices = @transform_5, window_bounds = array<i64: 128, 128>}, {pipeline_mode = #tpu.pipeline_mode<synchronous>, transform_indices = @transform_6, window_bounds = array<i64: 1, 128>}, {transform_indices = @transform_7, window_bounds = array<i64: 8, 128>}]} {
    %c0 = arith.constant 0 : index
    %c0_0 = arith.constant 0 : index
    %0 = vector.load %arg1[%c0, %c0_0] : memref<32x128xbf16, #tpu.memory_space<vmem>>, vector<32x128xbf16>
    %c0_1 = arith.constant 0 : index
    %c0_2 = arith.constant 0 : index
    %1 = vector.load %arg2[%c0_1, %c0_2] : memref<128x128xbf16, #tpu.memory_space<vmem>>, vector<128x128xbf16>
    %c0_3 = arith.constant 0 : index
    %c0_4 = arith.constant 0 : index
    %2 = vector.load %arg3[%c0_3, %c0_4] : memref<1x128xf32, #tpu.memory_space<vmem>>, vector<1x128xf32>
    %cst = arith.constant dense<0.000000e+00> : vector<32x128xf32>
    %3 = tpu.matmul %0, %1, %cst {dimension_numbers = #tpu.dot_dimension_numbers<[1], [0], [0], [1], [0, 0, 1, 1], [], []>} : vector<32x128xbf16>, vector<128x128xbf16>, vector<32x128xf32> -> vector<32x128xf32>
    %4 = vector.broadcast %2 : vector<1x128xf32> to vector<32x128xf32>
    %5 = arith.addf %3, %4 : vector<32x128xf32>
    %cst_5 = arith.constant 0.000000e+00 : f32
    %6 = vector.broadcast %cst_5 : f32 to vector<32x128xf32>
    %7 = arith.maximumf %5, %6 : vector<32x128xf32>
    %c0_6 = arith.constant 0 : index
    %c0_7 = arith.constant 0 : index
    %8 = vector.load %arg4[%c0_6, %c0_7] : memref<128x128xbf16, #tpu.memory_space<vmem>>, vector<128x128xbf16>
    %c0_8 = arith.constant 0 : index
    %c0_9 = arith.constant 0 : index
    %9 = vector.load %arg5[%c0_8, %c0_9] : memref<1x128xf32, #tpu.memory_space<vmem>>, vector<1x128xf32>
    %10 = arith.truncf %7 : vector<32x128xf32> to vector<32x128xbf16>
    %cst_10 = arith.constant dense<0.000000e+00> : vector<32x128xf32>
    %11 = tpu.matmul %10, %8, %cst_10 {dimension_numbers = #tpu.dot_dimension_numbers<[1], [0], [0], [1], [0, 0, 1, 1], [], []>} : vector<32x128xbf16>, vector<128x128xbf16>, vector<32x128xf32> -> vector<32x128xf32>
    %12 = vector.broadcast %9 : vector<1x128xf32> to vector<32x128xf32>
    %13 = arith.addf %11, %12 : vector<32x128xf32>
    %cst_11 = arith.constant 0.000000e+00 : f32
    %14 = vector.broadcast %cst_11 : f32 to vector<32x128xf32>
    %15 = arith.maximumf %13, %14 : vector<32x128xf32>
    %16 = vector.extract_strided_slice %15 {offsets = [0, 0], sizes = [8, 128], strides = [1, 1]} : vector<32x128xf32> to vector<8x128xf32>
    %17 = vector.extract_strided_slice %15 {offsets = [8, 0], sizes = [8, 128], strides = [1, 1]} : vector<32x128xf32> to vector<8x128xf32>
    %18 = arith.maximumf %16, %17 : vector<8x128xf32>
    %19 = vector.extract_strided_slice %15 {offsets = [16, 0], sizes = [8, 128], strides = [1, 1]} : vector<32x128xf32> to vector<8x128xf32>
    %20 = arith.maximumf %18, %19 : vector<8x128xf32>
    %21 = vector.extract_strided_slice %15 {offsets = [24, 0], sizes = [8, 128], strides = [1, 1]} : vector<32x128xf32> to vector<8x128xf32>
    %22 = arith.maximumf %20, %21 : vector<8x128xf32>
    %c0_12 = arith.constant 0 : index
    %c0_13 = arith.constant 0 : index
    %23 = vector.load %arg6[%c0_12, %c0_13] : memref<128x128xf32, #tpu.memory_space<vmem>>, vector<128x128xf32>
    %c0_14 = arith.constant 0 : index
    %c0_15 = arith.constant 0 : index
    %24 = vector.load %arg7[%c0_14, %c0_15] : memref<1x128xf32, #tpu.memory_space<vmem>>, vector<1x128xf32>
    %cst_16 = arith.constant dense<0.000000e+00> : vector<8x128xf32>
    %25 = tpu.matmul %22, %23, %cst_16 {dimension_numbers = #tpu.dot_dimension_numbers<[1], [0], [0], [1], [0, 0, 1, 1], [], []>} : vector<8x128xf32>, vector<128x128xf32>, vector<8x128xf32> -> vector<8x128xf32>
    %26 = vector.broadcast %24 : vector<1x128xf32> to vector<8x128xf32>
    %27 = arith.addf %25, %26 : vector<8x128xf32>
    %c0_17 = arith.constant 0 : index
    %c0_18 = arith.constant 0 : index
    %28 = vector.load %arg8[%c0_17, %c0_18] : memref<8x128xf32, #tpu.memory_space<vmem>>, vector<8x128xf32>
    tpu.vector_store %arg8[%c0_17, %c0_18], %27 {strides = array<i32>} : memref<8x128xf32, #tpu.memory_space<vmem>>, vector<8x128xf32>,
    return
  }
  func.func @transform_0(%arg0: i32) -> (i32, i32) {
    %c0_i32 = arith.constant 0 : i32
    %c0_i32_0 = arith.constant 0 : i32
    return %arg0, %c0_i32 : i32, i32
  }
  func.func @transform_1(%arg0: i32) -> (i32, i32) {
    %c0_i32 = arith.constant 0 : i32
    %c0_i32_0 = arith.constant 0 : i32
    %c0_i32_1 = arith.constant 0 : i32
    return %c0_i32, %c0_i32_0 : i32, i32
  }
  func.func @transform_2(%arg0: i32) -> (i32, i32) {
    %c0_i32 = arith.constant 0 : i32
    %c0_i32_0 = arith.constant 0 : i32
    %c0_i32_1 = arith.constant 0 : i32
    return %c0_i32, %c0_i32_0 : i32, i32
  }
  func.func @transform_3(%arg0: i32) -> (i32, i32) {
    %c0_i32 = arith.constant 0 : i32
    %c0_i32_0 = arith.constant 0 : i32
    %c0_i32_1 = arith.constant 0 : i32
    return %c0_i32, %c0_i32_0 : i32, i32
  }
  func.func @transform_4(%arg0: i32) -> (i32, i32) {
    %c0_i32 = arith.constant 0 : i32
    %c0_i32_0 = arith.constant 0 : i32
    %c0_i32_1 = arith.constant 0 : i32
    return %c0_i32, %c0_i32_0 : i32, i32
  }
  func.func @transform_5(%arg0: i32) -> (i32, i32) {
    %c0_i32 = arith.constant 0 : i32
    %c0_i32_0 = arith.constant 0 : i32
    %c0_i32_1 = arith.constant 0 : i32
    return %c0_i32, %c0_i32_0 : i32, i32
  }
  func.func @transform_6(%arg0: i32) -> (i32, i32) {
    %c0_i32 = arith.constant 0 : i32
    %c0_i32_0 = arith.constant 0 : i32
    %c0_i32_1 = arith.constant 0 : i32
    return %c0_i32, %c0_i32_0 : i32, i32
  }
  func.func @transform_7(%arg0: i32) -> (i32, i32) {
    %c0_i32 = arith.constant 0 : i32
    %c0_i32_0 = arith.constant 0 : i32
    return %arg0, %c0_i32 : i32, i32
  }
}

</mosaic_0001>

<bundles_post_ra>
// kernel: custom-call.16
= control target key start
LH: loop header
LB: loop body
LE: loop exit
PB: predicated region body
PF: predicated region fallthrough
CT: control target
= control target key end

     0   :  { %s6_s0 = inlined_call_operand.vmem [shape: f32[8,16], index: 0, kind: output, shape index: {}]  }

// kernel: custom-call.17
= control target key start
LH: loop header
LB: loop body
LE: loop exit
PB: predicated region body
PF: predicated region fallthrough
CT: control target
= control target key end

     0   :  { %s6_s0 = inlined_call_operand.vmem [shape: f32[8,8], index: 0, kind: output, shape index: {}]  }

// kernel: _lambda_.3
= control target key start
LH: loop header
LB: loop body
LE: loop exit
PB: predicated region body
PF: predicated region fallthrough
CT: control target
= control target key end

     0   :  { %s1256_s18 = smov 0   ;;  %s1429_s0 = inlined_call_operand.vmem [shape: bf16[512,128], index: 0, kind: input, shape index: {}]   ;;  %s1430_s1 = inlined_call_operand.vmem [shape: bf16[128,128], index: 1, kind: input, shape index: {}]   ;;  %s1431_s2 = inlined_call_operand.vmem [shape: f32[1,128], index: 2, kind: input, shape index: {}]   ;;  %s1432_s3 = inlined_call_operand.vmem [shape: bf16[128,128], index: 3, kind: input, shape index: {}]   ;;  %s1433_s4 = inlined_call_operand.vmem [shape: f32[1,128], index: 4, kind: input, shape index: {}]   ;;  %s1434_s5 = inlined_call_operand.vmem [shape: f32[64,128], index: 5, kind: output, shape index: {}]  }
   0x1 LB: > { %s989_s19 = sadd.s32 4294967295, %s1224_s18   ;;  %p993_p0 = scmp.ge.s32.totalorder %s1224_s18, 1  ;;  %s1224_s18 = sphi %s1256_s18, %s15_s18  }
   0x2   : > { %p188_p1 = scmp.lt.s32.totalorder %s1224_s18, 3 }
   0x4   : > { %p189_p2 = pnand %p993_p0, %p188_p1 }
   0x5   : > { %s994_s22 = sshll.u32 (!%p189_p2), %s989_s19, 5  ;;  %s1395_s13 = sshll.u32 (!%p189_p2), %s989_s19, 2 }
   0x6   : > { %192 = sbr.rel (%p189_p2) target bundleno = 512 (0x200), region = 40  ;;  %p217_p3 = scmp.lt.s32.totalorder (!%p189_p2), %s994_s22, 63 }
   0x7   : > { %p223_p4 = scmp.lt.s32.totalorder (!%p189_p2), %s1395_s13, 7 }
   0xb   : > { %v1186_v0 = vld [vmem:[%s1430_s1 + $0x38] sm:$0xff]   ;;  %v1187_v1 = vld [vmem:[%s1430_s1 + $0x30] sm:$0xff]   ;;  %s1436_s22 = smov (!%p217_p3, %s994_s22), 63  ;;  %v1188_v2 = vld [vmem:[%s1430_s1 + $0x28] sm:$0xff]   ;;  %s1438_s13 = smov (!%p223_p4, %s1395_s13), 7 }
   0xc   : > { %1082 = vmatprep.subr.bf16.mxu0 %v1186_v0  ;;  %s995_s27 = sshll.u32 %s1436_s22, 2  ;;  %v1189_v3 = vld [vmem:[%s1430_s1 + $0x20] sm:$0xff]   ;;  %v1190_v5 = vld [vmem:[%s1430_s1 + $0x18] sm:$0xff]   ;;  %v1191_v6 = vld [vmem:[%s1430_s1 + $0x10] sm:$0xff]   ;;  %s997_s19 = sshll.u32 %s1438_s13, 3 }
   0xd   : > { %1083 = vmatpush3.bf16.msra.mxu0 %v1186_v0  ;;  %s1278_s30 = scalar_lea.vmem %s1429_s0, %s995_s27  ;;  %v1192_v7 = vld [vmem:[%s1430_s1 + $0x8] sm:$0xff]   ;;  %v1193_v8 = vld [vmem:[%s1430_s1] sm:$0xff]   ;;  %v1210_v9 = vld [vmem:[%s1432_s3 + $0x38] sm:$0xff]   ;;  %s226_s16 = scalar_lea.vmem %s1434_s5, %s997_s19 }
   0xe   : > { %1084 = vmatprep.subr.bf16.mxu0 %v1187_v1  ;;  %v1194_v4 = vld [vmem:[%s1278_s30] sm:$0xff]   ;;  %v1211_v10 = vld [vmem:[%s1432_s3 + $0x30] sm:$0xff]   ;;  %1130 = vmatprep.subr.bf16.mxu1 %v1210_v9  ;;  %v1195_v11 = vld [vmem:[%s1278_s30 + $0x8] sm:$0xff]  }
   0xf   : > { %1098 = vmatprep.mubr.bf16.mxu0 %v1194_v4  ;;  %1131 = vmatpush3.bf16.msra.mxu1 %v1210_v9  ;;  %v1212_v12 = vld [vmem:[%s1432_s3 + $0x28] sm:$0xff]   ;;  %v1196_v13 = vld [vmem:[%s1278_s30 + $0x10] sm:$0xff]   ;;  %v1213_v14 = vld [vmem:[%s1432_s3 + $0x20] sm:$0xff]  }
  0x10   : > { %1132 = vmatprep.subr.bf16.mxu1 %v1211_v10  ;;  %v1214_v15 = vld [vmem:[%s1432_s3 + $0x18] sm:$0xff]   ;;  %v1198_v17 = vld [vmem:[%s1278_s30 + $0x20] sm:$0xff]   ;;  %v1199_v18 = vld [vmem:[%s1278_s30 + $0x28] sm:$0xff]  }
  0x11   : > { %1085 = vmatpush3.bf16.msra.mxu0 %v1187_v1  ;;  %v1197_v16 = vld [vmem:[%s1278_s30 + $0x18] sm:$0xff]   ;;  %v1200_v19 = vld [vmem:[%s1278_s30 + $0x30] sm:$0xff]   ;;  %v1202_v21 = vld [vmem:[%s1278_s30 + $0x40] sm:$0xff]  }
  0x12   : > { %1086 = vmatprep.subr.bf16.mxu0 %v1188_v2  ;;  %v1201_v20 = vld [vmem:[%s1278_s30 + $0x38] sm:$0xff]   ;;  %v1203_v22 = vld [vmem:[%s1278_s30 + $0x48] sm:$0xff]   ;;  %v1204_v23 = vld [vmem:[%s1278_s30 + $0x50] sm:$0xff]  }
  0x13   : > { %1133 = vmatpush3.bf16.msra.mxu1 %v1211_v10  ;;  %v1205_v24 = vld [vmem:[%s1278_s30 + $0x58] sm:$0xff]   ;;  %v1206_v25 = vld [vmem:[%s1278_s30 + $0x60] sm:$0xff]   ;;  %v1207_v26 = vld [vmem:[%s1278_s30 + $0x68] sm:$0xff]  }
  0x14   : > { %1134 = vmatprep.subr.bf16.mxu1 %v1212_v12  ;;  %v1208_v27 = vld [vmem:[%s1278_s30 + $0x70] sm:$0xff]   ;;  %v1209_v28 = vld [vmem:[%s1278_s30 + $0x78] sm:$0xff]   ;;  %v1216_v30 = vld [vmem:[%s1432_s3 + $0x8] sm:$0xff]  }
  0x15   : > { %1087 = vmatpush3.bf16.msra.mxu0 %v1188_v2  ;;  %v1215_v29 = vld [vmem:[%s1432_s3 + $0x10] sm:$0xff]   ;;  %v1217_v31 = vld [vmem:[%s1432_s3] sm:$0xff]  }
  0x16   : > { %1088 = vmatprep.subr.bf16.mxu0 %v1189_v3  ;;  %v1338_v34 = vld [vmem:[%s1431_s2] ss:$0 sm:$0xff] }
  0x17   : > { %1135 = vmatpush3.bf16.msra.mxu1 %v1212_v12 }
  0x18   : > { %1136 = vmatprep.subr.bf16.mxu1 %v1213_v14 }
  0x19   : > { %1089 = vmatpush3.bf16.msra.mxu0 %v1189_v3 }
  0x1a   : > { %1090 = vmatprep.subr.bf16.mxu0 %v1190_v5 }
  0x1b   : > { %1137 = vmatpush3.bf16.msra.mxu1 %v1213_v14 }
  0x1c   : > { %1138 = vmatprep.subr.bf16.mxu1 %v1214_v15 }
  0x1d   : > { %1091 = vmatpush3.bf16.msra.mxu0 %v1190_v5 }
  0x1e   : > { %1092 = vmatprep.subr.bf16.mxu0 %v1191_v6 }
  0x1f   : > { %1139 = vmatpush3.bf16.msra.mxu1 %v1214_v15 }
  0x20   : > { %1140 = vmatprep.subr.bf16.mxu1 %v1215_v29 }
  0x21   : > { %1093 = vmatpush3.bf16.msra.mxu0 %v1191_v6 }
  0x22   : > { %1094 = vmatprep.subr.bf16.mxu0 %v1192_v7 }
  0x23   : > { %1141 = vmatpush3.bf16.msra.mxu1 %v1215_v29 }
  0x24   : > { %1142 = vmatprep.subr.bf16.mxu1 %v1216_v30 }
  0x25   : > { %1095 = vmatpush3.bf16.msra.mxu0 %v1192_v7 }
  0x26   : > { %1096 = vmatprep.subr.bf16.mxu0 %v1193_v8 }
  0x27   : > { %1143 = vmatpush3.bf16.msra.mxu1 %v1216_v30 }
  0x28   : > { %1144 = vmatprep.subr.bf16.mxu1 %v1217_v31 }
  0x29   : > { %1097 = vmatpush3.bf16.msra.mxu0 %v1193_v8 }
  0x2b   : > { %1145 = vmatpush3.bf16.msra.mxu1 %v1217_v31 }
  0x2c   : > { %1099 = vmatmul.mubr.bf16.vlgmr.msra.gmra.mxu0 %v1195_v11 }
  0x2d   : > { %1102 = vmatprep.mubr.bf16.mxu0 %v1196_v13 }
  0x34   : > { %1103 = vmatmul.mubr.bf16.gmra.mxu0 %v1197_v16 }
  0x35   : > { %1106 = vmatprep.mubr.bf16.mxu0 %v1198_v17 }
  0x3c   : > { %1107 = vmatmul.mubr.bf16.gmra.mxu0 %v1199_v18 }
  0x3d   : > { %1110 = vmatprep.mubr.bf16.mxu0 %v1200_v19 }
  0x44   : > { %1111 = vmatmul.mubr.bf16.gmra.mxu0 %v1201_v20 }
  0x45   : > { %1114 = vmatprep.mubr.bf16.mxu0 %v1202_v21 }
  0x4c   : > { %1115 = vmatmul.mubr.bf16.gmra.mxu0 %v1203_v22 }
  0x4d   : > { %1118 = vmatprep.mubr.bf16.mxu0 %v1204_v23 }
  0x54   : > { %1119 = vmatmul.mubr.bf16.gmra.mxu0 %v1205_v24 }
  0x55   : > { %1122 = vmatprep.mubr.bf16.mxu0 %v1206_v25 }
  0x5c   : > { %1123 = vmatmul.mubr.bf16.gmra.mxu0 %v1207_v26 }
  0x5d   : > { %1126 = vmatprep.mubr.bf16.mxu0 %v1208_v27 }
  0x64   : > { %1127 = vmatmul.mubr.bf16.gmra.mxu0 %v1209_v28 }
  0xec   : > { %v1100_v32 = vpop.f32.mrf.mxu0 }
  0xed   : > { %v471_v38 = vadd.f32 %v1100_v32, %v1338_v34 }
  0xee   : > { %v462_v33 = vpop.f32.mrf.mxu0 }
  0xef   : > { %v463_v36 = vadd.f32 %v1338_v34, %v462_v33  ;;  %v591_v45 = vmax.f32 %v471_v38, 0.0 }
  0xf0   : > { %v1101_v35 = vpop.f32.mrf.mxu0 }
  0xf1   : > { %v474_v37 = vadd.f32 %v1101_v35, %v1338_v34  ;;  %v589_v43 = vmax.f32 %v463_v36, 0.0 }
  0xf2   : > { %v465_v39 = vpop.f32.mrf.mxu0 }
  0xf3   : > { %v466_v40 = vadd.f32 %v1338_v34, %v465_v39  ;;  %v592_v41 = vmax.f32 %v474_v37, 0.0 }
  0xf4   : > { %v1104_v42 = vpop.f32.mrf.mxu0 }
  0xf5   : > { %v590_v44 = vmax.f32 %v466_v40, 0.0  ;;  %v639_v48 = vpack.c.bf16 %v592_v41, %v591_v45  ;;  %v487_v52 = vadd.f32 %v1104_v42, %v1338_v34 }
  0xf6   : > { %v478_v46 = vpop.f32.mrf.mxu0 }
  0xf7   : > { %v638_v47 = vpack.c.bf16 %v590_v44, %v589_v43  ;;  %v479_v50 = vadd.f32 %v1338_v34, %v478_v46  ;;  %v595_v59 = vmax.f32 %v487_v52, 0.0 }
  0xf8   : > { %v1105_v49 = vpop.f32.mrf.mxu0 }
  0xf9   : > { %v490_v51 = vadd.f32 %v1105_v49, %v1338_v34  ;;  %1146 = vmatprep.mubr.bf16.mxu1 %v638_v47  ;;  %v593_v57 = vmax.f32 %v479_v50, 0.0 }
  0xfa   : > { %v481_v53 = vpop.f32.mrf.mxu0  ;;  %1147 = vmatmul.mubr.bf16.vlgmr.msra.gmra.mxu1 %v639_v48 }
  0xfb   : > { %v482_v54 = vadd.f32 %v1338_v34, %v481_v53  ;;  %v596_v55 = vmax.f32 %v490_v51, 0.0 }
  0xfc   : > { %v1108_v56 = vpop.f32.mrf.mxu0 }
  0xfd   : > { %v594_v58 = vmax.f32 %v482_v54, 0.0  ;;  %v641_v62 = vpack.c.bf16 %v596_v55, %v595_v59  ;;  %v503_v2 = vadd.f32 %v1108_v56, %v1338_v34 }
  0xfe   : > { %v494_v60 = vpop.f32.mrf.mxu0 }
  0xff   : > { %v640_v61 = vpack.c.bf16 %v594_v58, %v593_v57  ;;  %v495_v0 = vadd.f32 %v1338_v34, %v494_v60  ;;  %v599_v9 = vmax.f32 %v503_v2, 0.0 }
 0x100   : > { %v1109_v63 = vpop.f32.mrf.mxu0 }
 0x101   : > { %v506_v1 = vadd.f32 %v1109_v63, %v1338_v34  ;;  %1150 = vmatprep.mubr.bf16.mxu1 %v640_v61  ;;  %v597_v7 = vmax.f32 %v495_v0, 0.0 }
 0x102   : > { %v497_v3 = vpop.f32.mrf.mxu0  ;;  %1151 = vmatmul.mubr.bf16.gmra.mxu1 %v641_v62 }
 0x103   : > { %v498_v4 = vadd.f32 %v1338_v34, %v497_v3  ;;  %v600_v5 = vmax.f32 %v506_v1, 0.0 }
 0x104   : > { %v1112_v6 = vpop.f32.mrf.mxu0 }
 0x105   : > { %v598_v8 = vmax.f32 %v498_v4, 0.0  ;;  %v643_v12 = vpack.c.bf16 %v600_v5, %v599_v9  ;;  %v519_v16 = vadd.f32 %v1112_v6, %v1338_v34 }
 0x106   : > { %v510_v10 = vpop.f32.mrf.mxu0 }
 0x107   : > { %v642_v11 = vpack.c.bf16 %v598_v8, %v597_v7  ;;  %v511_v14 = vadd.f32 %v1338_v34, %v510_v10  ;;  %v603_v23 = vmax.f32 %v519_v16, 0.0 }
 0x108   : > { %v1113_v13 = vpop.f32.mrf.mxu0 }
 0x109   : > { %v522_v15 = vadd.f32 %v1113_v13, %v1338_v34  ;;  %1154 = vmatprep.mubr.bf16.mxu1 %v642_v11  ;;  %v601_v21 = vmax.f32 %v511_v14, 0.0 }
 0x10a   : > { %v513_v17 = vpop.f32.mrf.mxu0  ;;  %1155 = vmatmul.mubr.bf16.gmra.mxu1 %v643_v12 }
 0x10b   : > { %v514_v18 = vadd.f32 %v1338_v34, %v513_v17  ;;  %v604_v19 = vmax.f32 %v522_v15, 0.0 }
 0x10c   : > { %v1116_v20 = vpop.f32.mrf.mxu0 }
 0x10d   : > { %v602_v22 = vmax.f32 %v514_v18, 0.0  ;;  %v645_v26 = vpack.c.bf16 %v604_v19, %v603_v23  ;;  %v535_v30 = vadd.f32 %v1116_v20, %v1338_v34 }
 0x10e   : > { %v526_v24 = vpop.f32.mrf.mxu0 }
 0x10f   : > { %v644_v25 = vpack.c.bf16 %v602_v22, %v601_v21  ;;  %v527_v28 = vadd.f32 %v1338_v34, %v526_v24  ;;  %v607_v38 = vmax.f32 %v535_v30, 0.0 }
 0x110   : > { %v1117_v27 = vpop.f32.mrf.mxu0 }
 0x111   : > { %v538_v29 = vadd.f32 %v1117_v27, %v1338_v34  ;;  %1158 = vmatprep.mubr.bf16.mxu1 %v644_v25  ;;  %v605_v36 = vmax.f32 %v527_v28, 0.0 }
 0x112   : > { %v529_v31 = vpop.f32.mrf.mxu0  ;;  %1159 = vmatmul.mubr.bf16.gmra.mxu1 %v645_v26 }
 0x113   : > { %v530_v32 = vadd.f32 %v1338_v34, %v529_v31  ;;  %v608_v33 = vmax.f32 %v538_v29, 0.0 }
 0x114   : > { %v1120_v35 = vpop.f32.mrf.mxu0 }
 0x115   : > { %v606_v37 = vmax.f32 %v530_v32, 0.0  ;;  %v647_v41 = vpack.c.bf16 %v608_v33, %v607_v38  ;;  %v551_v45 = vadd.f32 %v1120_v35, %v1338_v34  ;;  %v1375_v38 = vld [vmem:[%s1433_s4] ss:$0 sm:$0xff] }
 0x116   : > { %v542_v39 = vpop.f32.mrf.mxu0 }
 0x117   : > { %v646_v40 = vpack.c.bf16 %v606_v37, %v605_v36  ;;  %v543_v43 = vadd.f32 %v1338_v34, %v542_v39  ;;  %v611_v52 = vmax.f32 %v551_v45, 0.0 }
 0x118   : > { %v1121_v42 = vpop.f32.mrf.mxu0 }
 0x119   : > { %v554_v44 = vadd.f32 %v1121_v42, %v1338_v34  ;;  %1162 = vmatprep.mubr.bf16.mxu1 %v646_v40  ;;  %v609_v50 = vmax.f32 %v543_v43, 0.0 }
 0x11a   : > { %v545_v46 = vpop.f32.mrf.mxu0  ;;  %1163 = vmatmul.mubr.bf16.gmra.mxu1 %v647_v41 }
 0x11b   : > { %v546_v47 = vadd.f32 %v1338_v34, %v545_v46  ;;  %v612_v48 = vmax.f32 %v554_v44, 0.0 }
 0x11c   : > { %v1124_v49 = vpop.f32.mrf.mxu0 }
 0x11d   : > { %v610_v51 = vmax.f32 %v546_v47, 0.0  ;;  %v649_v55 = vpack.c.bf16 %v612_v48, %v611_v52  ;;  %v567_v59 = vadd.f32 %v1124_v49, %v1338_v34 }
 0x11e   : > { %v558_v53 = vpop.f32.mrf.mxu0 }
 0x11f   : > { %v648_v54 = vpack.c.bf16 %v610_v51, %v609_v50  ;;  %v559_v57 = vadd.f32 %v1338_v34, %v558_v53  ;;  %v615_v2 = vmax.f32 %v567_v59, 0.0 }
 0x120   : > { %v1125_v56 = vpop.f32.mrf.mxu0 }
 0x121   : > { %v570_v58 = vadd.f32 %v1125_v56, %v1338_v34  ;;  %1166 = vmatprep.mubr.bf16.mxu1 %v648_v54  ;;  %v613_v0 = vmax.f32 %v559_v57, 0.0 }
 0x122   : > { %v561_v60 = vpop.f32.mrf.mxu0  ;;  %1167 = vmatmul.mubr.bf16.gmra.mxu1 %v649_v55 }
 0x123   : > { %v562_v61 = vadd.f32 %v1338_v34, %v561_v60  ;;  %v616_v62 = vmax.f32 %v570_v58, 0.0 }
 0x124   : > { %v1128_v63 = vpop.f32.mrf.mxu0 }
 0x125   : > { %v614_v1 = vmax.f32 %v562_v61, 0.0  ;;  %v651_v5 = vpack.c.bf16 %v616_v62, %v615_v2  ;;  %v583_v9 = vadd.f32 %v1128_v63, %v1338_v34 }
 0x126   : > { %v574_v3 = vpop.f32.mrf.mxu0 }
 0x127   : > { %v650_v4 = vpack.c.bf16 %v614_v1, %v613_v0  ;;  %v575_v7 = vadd.f32 %v1338_v34, %v574_v3  ;;  %v619_v15 = vmax.f32 %v583_v9, 0.0 }
 0x128   : > { %v1129_v6 = vpop.f32.mrf.mxu0 }
 0x129   : > { %v586_v8 = vadd.f32 %v1129_v6, %v1338_v34  ;;  %1170 = vmatprep.mubr.bf16.mxu1 %v650_v4  ;;  %v617_v13 = vmax.f32 %v575_v7, 0.0 }
 0x12a   : > { %v577_v10 = vpop.f32.mrf.mxu0  ;;  %1171 = vmatmul.mubr.bf16.gmra.mxu1 %v651_v5 }
 0x12b   : > { %v578_v11 = vadd.f32 %v1338_v34, %v577_v10  ;;  %v620_v12 = vmax.f32 %v586_v8, 0.0 }
 0x12d   : > { %v618_v14 = vmax.f32 %v578_v11, 0.0  ;;  %v653_v17 = vpack.c.bf16 %v620_v12, %v619_v15 }
 0x12f   : > { %v652_v16 = vpack.c.bf16 %v618_v14, %v617_v13 }
 0x131   : > { %1174 = vmatprep.mubr.bf16.mxu1 %v652_v16 }
 0x132   : > { %1175 = vmatmul.mubr.bf16.gmra.mxu1 %v653_v17 }
 0x1ba   : > { %v1148_v18 = vpop.f32.mrf.mxu1 }
 0x1bb   : > { %v751_v40 = vadd.f32 %v1148_v18, %v1375_v38 }
 0x1bc   : > { %v742_v19 = vpop.f32.mrf.mxu1 }
 0x1bd   : > { %v743_v44 = vadd.f32 %v1375_v38, %v742_v19  ;;  %v871_v52 = vmax.f32 %v751_v40, 0.0 }
 0x1be   : > { %v1149_v20 = vpop.f32.mrf.mxu1 }
 0x1bf   : > { %v754_v46 = vadd.f32 %v1149_v20, %v1375_v38  ;;  %v869_v57 = vmax.f32 %v743_v44, 0.0 }
 0x1c0   : > { %v745_v21 = vpop.f32.mrf.mxu1 }
 0x1c1   : > { %v746_v50 = vadd.f32 %v1375_v38, %v745_v21  ;;  %v872_v61 = vmax.f32 %v754_v46, 0.0 }
 0x1c2   : > { %v1152_v22 = vpop.f32.mrf.mxu1 }
 0x1c3   : > { %v767_v41 = vadd.f32 %v1152_v22, %v1375_v38  ;;  %v870_v2 = vmax.f32 %v746_v50, 0.0 }
 0x1c4   : > { %v758_v23 = vpop.f32.mrf.mxu1 }
 0x1c5   : > { %v759_v42 = vadd.f32 %v1375_v38, %v758_v23  ;;  %v875_v53 = vmax.f32 %v767_v41, 0.0 }
 0x1c6   : > { %v1153_v24 = vpop.f32.mrf.mxu1 }
 0x1c7   : > { %v770_v45 = vadd.f32 %v1153_v24, %v1375_v38  ;;  %v873_v54 = vmax.f32 %v759_v42, 0.0  ;;  %v903_v6 = vmax.f32 %v871_v52, %v875_v53 }
 0x1c8   : > { %v761_v25 = vpop.f32.mrf.mxu1 }
 0x1c9   : > { %v762_v47 = vadd.f32 %v1375_v38, %v761_v25  ;;  %v876_v58 = vmax.f32 %v770_v45, 0.0  ;;  %v901_v7 = vmax.f32 %v869_v57, %v873_v54 }
 0x1ca   : > { %v1156_v26 = vpop.f32.mrf.mxu1 }
 0x1cb   : > { %v783_v48 = vadd.f32 %v1156_v26, %v1375_v38  ;;  %v874_v62 = vmax.f32 %v762_v47, 0.0  ;;  %v904_v11 = vmax.f32 %v872_v61, %v876_v58 }
 0x1cc   : > { %v774_v27 = vpop.f32.mrf.mxu1 }
 0x1cd   : > { %v775_v51 = vadd.f32 %v1375_v38, %v774_v27  ;;  %v879_v63 = vmax.f32 %v783_v48, 0.0  ;;  %v902_v15 = vmax.f32 %v870_v2, %v874_v62 }
 0x1ce   : > { %v1157_v28 = vpop.f32.mrf.mxu1 }
 0x1cf   : > { %v786_v55 = vadd.f32 %v1157_v28, %v1375_v38  ;;  %v877_v3 = vmax.f32 %v775_v51, 0.0  ;;  %v907_v16 = vmax.f32 %v903_v6, %v879_v63 }
 0x1d0   : > { %v777_v34 = vpop.f32.mrf.mxu1 }
 0x1d1   : > { %v778_v59 = vadd.f32 %v1375_v38, %v777_v34  ;;  %v880_v8 = vmax.f32 %v786_v55, 0.0  ;;  %v905_v20 = vmax.f32 %v901_v7, %v877_v3 }
 0x1d2   : > { %v1160_v29 = vpop.f32.mrf.mxu1 }
 0x1d3   : > { %v799_v0 = vadd.f32 %v1160_v29, %v1375_v38  ;;  %v878_v12 = vmax.f32 %v778_v59, 0.0  ;;  %v908_v24 = vmax.f32 %v904_v11, %v880_v8 }
 0x1d4   : > { %v790_v30 = vpop.f32.mrf.mxu1 }
 0x1d5   : > { %v791_v60 = vadd.f32 %v1375_v38, %v790_v30  ;;  %v883_v17 = vmax.f32 %v799_v0, 0.0  ;;  %v906_v34 = vmax.f32 %v902_v15, %v878_v12 }
 0x1d6   : > { %v1161_v31 = vpop.f32.mrf.mxu1 }
 0x1d7   : > { %v802_v4 = vadd.f32 %v1161_v31, %v1375_v38  ;;  %v881_v13 = vmax.f32 %v791_v60, 0.0 }
 0x1d8   : > { %v793_v32 = vpop.f32.mrf.mxu1 }
 0x1d9   : > { %v794_v9 = vadd.f32 %v1375_v38, %v793_v32  ;;  %v884_v21 = vmax.f32 %v802_v4, 0.0  ;;  %v909_v29 = vmax.f32 %v905_v20, %v881_v13  ;;  %v911_v32 = vmax.f32 %v907_v16, %v883_v17 }
 0x1da   : > { %v1164_v33 = vpop.f32.mrf.mxu1 }
 0x1db   : > { %v882_v25 = vmax.f32 %v794_v9, 0.0  ;;  %v815_v26 = vadd.f32 %v1164_v33, %v1375_v38  ;;  %v912_v41 = vmax.f32 %v908_v24, %v884_v21 }
 0x1dc   : > { %v806_v35 = vpop.f32.mrf.mxu1 }
 0x1dd   : > { %v807_v5 = vadd.f32 %v1375_v38, %v806_v35  ;;  %v910_v44 = vmax.f32 %v906_v34, %v882_v25  ;;  %v887_v45 = vmax.f32 %v815_v26, 0.0 }
 0x1de   : > { %v1165_v36 = vpop.f32.mrf.mxu1 }
 0x1df   : > { %v885_v22 = vmax.f32 %v807_v5, 0.0  ;;  %v818_v27 = vadd.f32 %v1165_v36, %v1375_v38  ;;  %v915_v61 = vmax.f32 %v911_v32, %v887_v45 }
 0x1e0   : > { %v809_v37 = vpop.f32.mrf.mxu1 }
 0x1e1   : > { %v810_v18 = vadd.f32 %v1375_v38, %v809_v37  ;;  %v913_v36 = vmax.f32 %v909_v29, %v885_v22  ;;  %v888_v46 = vmax.f32 %v818_v27, 0.0 }
 0x1e2   : > { %v1377_v39 = vpop.f32.mrf.mxu1 }
 0x1e3   : > { %v886_v35 = vmax.f32 %v810_v18, 0.0  ;;  %v831_v37 = vadd.f32 %v1377_v39, %v1375_v38  ;;  %v916_v62 = vmax.f32 %v912_v41, %v888_v46 }
 0x1e4   : > { %v822_v43 = vpop.f32.mrf.mxu1 }
 0x1e5   : > { %v823_v14 = vadd.f32 %v1375_v38, %v822_v43  ;;  %v891_v53 = vmax.f32 %v831_v37, 0.0 }
 0x1e6   : > { %v1169_v49 = vpop.f32.mrf.mxu1 }
 0x1e7   : > { %v889_v30 = vmax.f32 %v823_v14, 0.0  ;;  %v834_v40 = vadd.f32 %v1169_v49, %v1375_v38  ;;  %v914_v49 = vmax.f32 %v910_v44, %v886_v35  ;;  %v919_v5 = vmax.f32 %v915_v61, %v891_v53 }
 0x1e8   : > { %v825_v56 = vpop.f32.mrf.mxu1 }
 0x1e9   : > { %v826_v31 = vadd.f32 %v1375_v38, %v825_v56  ;;  %v917_v50 = vmax.f32 %v913_v36, %v889_v30  ;;  %v892_v54 = vmax.f32 %v834_v40, 0.0 }
 0x1ea   : > { %v1172_v1 = vpop.f32.mrf.mxu1 }
 0x1eb   : > { %v847_v47 = vadd.f32 %v1172_v1, %v1375_v38  ;;  %v890_v51 = vmax.f32 %v826_v31, 0.0  ;;  %v920_v7 = vmax.f32 %v916_v62, %v892_v54 }
 0x1ec   : > { %v838_v10 = vpop.f32.mrf.mxu1 }
 0x1ed   : > { %v839_v23 = vadd.f32 %v1375_v38, %v838_v10  ;;  %v895_v63 = vmax.f32 %v847_v47, 0.0  ;;  %v918_v1 = vmax.f32 %v914_v49, %v890_v51 }
 0x1ee   : > { %v1173_v19 = vpop.f32.mrf.mxu1 }
 0x1ef   : > { %v893_v42 = vmax.f32 %v839_v23, 0.0  ;;  %v850_v52 = vadd.f32 %v1173_v19, %v1375_v38  ;;  %v923_v11 = vmax.f32 %v919_v5, %v895_v63 }
 0x1f0   : > { %v841_v28 = vpop.f32.mrf.mxu1 }
 0x1f1   : > { %v842_v43 = vadd.f32 %v1375_v38, %v841_v28  ;;  %v921_v57 = vmax.f32 %v917_v50, %v893_v42  ;;  %v896_v2 = vmax.f32 %v850_v52, 0.0 }
 0x1f2   : > { %v1176_v33 = vpop.f32.mrf.mxu1 }
 0x1f3   : > { %v863_v55 = vadd.f32 %v1176_v33, %v1375_v38  ;;  %v894_v58 = vmax.f32 %v842_v43, 0.0  ;;  %v924_v12 = vmax.f32 %v920_v7, %v896_v2 }
 0x1f4   : > { %v854_v48 = vpop.f32.mrf.mxu1 }
 0x1f5   : > { %v855_v39 = vadd.f32 %v1375_v38, %v854_v48  ;;  %v899_v6 = vmax.f32 %v863_v55, 0.0  ;;  %v922_v8 = vmax.f32 %v918_v1, %v894_v58 }
 0x1f6   : > { %v1177_v56 = vpop.f32.mrf.mxu1 }
 0x1f7   : > { %v897_v59 = vmax.f32 %v855_v39, 0.0  ;;  %v866_v60 = vadd.f32 %v1177_v56, %v1375_v38  ;;  %v927_v14 = vmax.f32 %v923_v11, %v899_v6 }
 0x1f8   : > { %v857_v0 = vpop.f32.mrf.mxu1 }
 0x1f9   : > { %v925_v3 = vmax.f32 %v921_v57, %v897_v59  ;;  %v858_v4 = vadd.f32 %v1375_v38, %v857_v0  ;;  %v900_v9 = vmax.f32 %v866_v60, 0.0  ;;  %931 = vst [vmem:[%s226_s16 + $0x10] sm:$0xff] %v927_v14 }
 0x1fb   : > { %929 = vst [vmem:[%s226_s16] sm:$0xff] %v925_v3  ;;  %v898_v10 = vmax.f32 %v858_v4, 0.0  ;;  %v928_v15 = vmax.f32 %v924_v12, %v900_v9 }
 0x1fd   : > { %v926_v13 = vmax.f32 %v922_v8, %v898_v10  ;;  %932 = vst [vmem:[%s226_s16 + $0x18] sm:$0xff] %v928_v15 }
 0x1ff   : > { %930 = vst [vmem:[%s226_s16 + $0x8] sm:$0xff] %v926_v13 }
 0x200 PF: > { %s15_s18 = sadd.s32 1, %s1224_s18  }
 0x201   : > { %p12_p5 = scmp.ge.s32.totalorder %s15_s18, 4  }
 0x203   :  { %14 = sbr.rel (!%p12_p5) target bundleno = 1 (0x1), region = 70 }

// kernel: _lambda_.4
= control target key start
LH: loop header
LB: loop body
LE: loop exit
PB: predicated region body
PF: predicated region fallthrough
CT: control target
= control target key end

     0   :  { %s788_s18 = smov 0   ;;  %s869_s0 = inlined_call_operand.vmem [shape: bf16[128,128], index: 0, kind: input, shape index: {}]   ;;  %s870_s1 = inlined_call_operand.vmem [shape: bf16[128,128], index: 1, kind: input, shape index: {}]   ;;  %s871_s2 = inlined_call_operand.vmem [shape: f32[1,128], index: 2, kind: input, shape index: {}]   ;;  %s872_s3 = inlined_call_operand.vmem [shape: bf16[128,128], index: 3, kind: input, shape index: {}]   ;;  %s873_s4 = inlined_call_operand.vmem [shape: f32[1,128], index: 4, kind: input, shape index: {}]   ;;  %s874_s5 = inlined_call_operand.vmem [shape: f32[32,128], index: 5, kind: output, shape index: {}]  }
   0x1 LB: > { %s617_s19 = sadd.s32 4294967295, %s756_s18   ;;  %p621_p0 = scmp.ge.s32.totalorder %s756_s18, 1  ;;  %s756_s18 = sphi %s788_s18, %s15_s18  }
   0x2   : > { %p188_p1 = scmp.lt.s32.totalorder %s756_s18, 3 }
   0x4   : > { %p189_p2 = pnand %p621_p0, %p188_p1 }
   0x5   : > { %s622_s22 = sshll.u32 (!%p189_p2), %s617_s19, 3  ;;  %s624_s11 = sshll.u32 (!%p189_p2), %s617_s19, 1 }
   0x6   : > { %192 = sbr.rel (%p189_p2) target bundleno = 466 (0x1d2), region = 40  ;;  %p217_p3 = scmp.lt.s32.totalorder (!%p189_p2), %s622_s22, 15 }
   0x7   : > { %p223_p4 = scmp.lt.s32.totalorder (!%p189_p2), %s624_s11, 3 }
   0xb   : > { %v730_v0 = vld [vmem:[%s870_s1 + $0x38] sm:$0xff]   ;;  %v731_v1 = vld [vmem:[%s870_s1 + $0x30] sm:$0xff]   ;;  %s876_s22 = smov (!%p217_p3, %s622_s22), 15  ;;  %v732_v2 = vld [vmem:[%s870_s1 + $0x28] sm:$0xff]   ;;  %s878_s11 = smov (!%p223_p4, %s624_s11), 3 }
   0xc   : > { %674 = vmatprep.subr.bf16.mxu0 %v730_v0  ;;  %s623_s27 = sshll.u32 %s876_s22, 2  ;;  %v733_v3 = vld [vmem:[%s870_s1 + $0x20] sm:$0xff]   ;;  %v734_v5 = vld [vmem:[%s870_s1 + $0x18] sm:$0xff]   ;;  %v743_v7 = vld [vmem:[%s872_s3 + $0x30] sm:$0xff]   ;;  %s625_s19 = sshll.u32 %s878_s11, 3 }
   0xd   : > { %675 = vmatpush3.bf16.msra.mxu0 %v730_v0  ;;  %s810_s30 = scalar_lea.vmem %s869_s0, %s623_s27  ;;  %v742_v6 = vld [vmem:[%s872_s3 + $0x38] sm:$0xff]   ;;  %v735_v8 = vld [vmem:[%s870_s1 + $0x10] sm:$0xff]   ;;  %v744_v9 = vld [vmem:[%s872_s3 + $0x28] sm:$0xff]   ;;  %s226_s16 = scalar_lea.vmem %s874_s5, %s625_s19 }
   0xe   : > { %676 = vmatprep.subr.bf16.mxu0 %v731_v1  ;;  %v738_v4 = vld [vmem:[%s810_s30] sm:$0xff]   ;;  %698 = vmatprep.subr.bf16.mxu1 %v742_v6  ;;  %v736_v10 = vld [vmem:[%s870_s1 + $0x8] sm:$0xff]   ;;  %v746_v13 = vld [vmem:[%s872_s3 + $0x18] sm:$0xff]  }
   0xf   : > { %690 = vmatprep.mubr.bf16.mxu0 %v738_v4  ;;  %699 = vmatpush3.bf16.msra.mxu1 %v742_v6  ;;  %v745_v11 = vld [vmem:[%s872_s3 + $0x20] sm:$0xff]   ;;  %v739_v14 = vld [vmem:[%s810_s30 + $0x8] sm:$0xff]   ;;  %v740_v15 = vld [vmem:[%s810_s30 + $0x10] sm:$0xff]  }
  0x10   : > { %700 = vmatprep.subr.bf16.mxu1 %v743_v7  ;;  %v737_v12 = vld [vmem:[%s870_s1] sm:$0xff]   ;;  %v741_v16 = vld [vmem:[%s810_s30 + $0x18] sm:$0xff]   ;;  %v747_v17 = vld [vmem:[%s872_s3 + $0x10] sm:$0xff]  }
  0x11   : > { %677 = vmatpush3.bf16.msra.mxu0 %v731_v1  ;;  %v748_v18 = vld [vmem:[%s872_s3 + $0x8] sm:$0xff]   ;;  %v749_v19 = vld [vmem:[%s872_s3] sm:$0xff]  }
  0x12   : > { %678 = vmatprep.subr.bf16.mxu0 %v732_v2  ;;  %v626_v22 = vld [vmem:[%s871_s2] ss:$0 sm:$0xff] }
  0x13   : > { %701 = vmatpush3.bf16.msra.mxu1 %v743_v7  ;;  %v639_v51 = vld [vmem:[%s873_s4] ss:$0 sm:$0xff] }
  0x14   : > { %702 = vmatprep.subr.bf16.mxu1 %v744_v9 }
  0x15   : > { %679 = vmatpush3.bf16.msra.mxu0 %v732_v2 }
  0x16   : > { %680 = vmatprep.subr.bf16.mxu0 %v733_v3 }
  0x17   : > { %703 = vmatpush3.bf16.msra.mxu1 %v744_v9 }
  0x18   : > { %704 = vmatprep.subr.bf16.mxu1 %v745_v11 }
  0x19   : > { %681 = vmatpush3.bf16.msra.mxu0 %v733_v3 }
  0x1a   : > { %682 = vmatprep.subr.bf16.mxu0 %v734_v5 }
  0x1b   : > { %705 = vmatpush3.bf16.msra.mxu1 %v745_v11 }
  0x1c   : > { %706 = vmatprep.subr.bf16.mxu1 %v746_v13 }
  0x1d   : > { %683 = vmatpush3.bf16.msra.mxu0 %v734_v5 }
  0x1e   : > { %684 = vmatprep.subr.bf16.mxu0 %v735_v8 }
  0x1f   : > { %707 = vmatpush3.bf16.msra.mxu1 %v746_v13 }
  0x20   : > { %708 = vmatprep.subr.bf16.mxu1 %v747_v17 }
  0x21   : > { %685 = vmatpush3.bf16.msra.mxu0 %v735_v8 }
  0x22   : > { %686 = vmatprep.subr.bf16.mxu0 %v736_v10 }
  0x23   : > { %709 = vmatpush3.bf16.msra.mxu1 %v747_v17 }
  0x24   : > { %710 = vmatprep.subr.bf16.mxu1 %v748_v18 }
  0x25   : > { %687 = vmatpush3.bf16.msra.mxu0 %v736_v10 }
  0x26   : > { %688 = vmatprep.subr.bf16.mxu0 %v737_v12 }
  0x27   : > { %711 = vmatpush3.bf16.msra.mxu1 %v748_v18 }
  0x28   : > { %712 = vmatprep.subr.bf16.mxu1 %v749_v19 }
  0x29   : > { %689 = vmatpush3.bf16.msra.mxu0 %v737_v12 }
  0x2b   : > { %713 = vmatpush3.bf16.msra.mxu1 %v749_v19 }
  0x2c   : > { %691 = vmatmul.mubr.bf16.vlgmr.msra.gmra.mxu0 %v739_v14 }
  0x2d   : > { %694 = vmatprep.mubr.bf16.mxu0 %v740_v15 }
  0x34   : > { %695 = vmatmul.mubr.bf16.gmra.mxu0 %v741_v16 }
  0xec   : > { %v692_v20 = vpop.f32.mrf.mxu0 }
  0xed   : > { %v375_v26 = vadd.f32 %v692_v20, %v626_v22 }
  0xee   : > { %v366_v21 = vpop.f32.mrf.mxu0 }
  0xef   : > { %v367_v24 = vadd.f32 %v626_v22, %v366_v21  ;;  %v399_v33 = vmax.f32 %v375_v26, 0.0 }
  0xf0   : > { %v693_v23 = vpop.f32.mrf.mxu0 }
  0xf1   : > { %v378_v25 = vadd.f32 %v693_v23, %v626_v22  ;;  %v397_v31 = vmax.f32 %v367_v24, 0.0 }
  0xf2   : > { %v369_v27 = vpop.f32.mrf.mxu0 }
  0xf3   : > { %v370_v28 = vadd.f32 %v626_v22, %v369_v27  ;;  %v400_v29 = vmax.f32 %v378_v25, 0.0 }
  0xf4   : > { %v696_v30 = vpop.f32.mrf.mxu0 }
  0xf5   : > { %v398_v32 = vmax.f32 %v370_v28, 0.0  ;;  %v423_v36 = vpack.c.bf16 %v400_v29, %v399_v33  ;;  %v391_v40 = vadd.f32 %v696_v30, %v626_v22 }
  0xf6   : > { %v382_v34 = vpop.f32.mrf.mxu0 }
  0xf7   : > { %v422_v35 = vpack.c.bf16 %v398_v32, %v397_v31  ;;  %v383_v38 = vadd.f32 %v626_v22, %v382_v34  ;;  %v403_v46 = vmax.f32 %v391_v40, 0.0 }
  0xf8   : > { %v697_v37 = vpop.f32.mrf.mxu0 }
  0xf9   : > { %v394_v39 = vadd.f32 %v697_v37, %v626_v22  ;;  %714 = vmatprep.mubr.bf16.mxu1 %v422_v35  ;;  %v401_v44 = vmax.f32 %v383_v38, 0.0 }
  0xfa   : > { %v385_v41 = vpop.f32.mrf.mxu0  ;;  %715 = vmatmul.mubr.bf16.vlgmr.msra.gmra.mxu1 %v423_v36 }
  0xfb   : > { %v386_v42 = vadd.f32 %v626_v22, %v385_v41  ;;  %v404_v43 = vmax.f32 %v394_v39, 0.0 }
  0xfd   : > { %v402_v45 = vmax.f32 %v386_v42, 0.0  ;;  %v425_v48 = vpack.c.bf16 %v404_v43, %v403_v46 }
  0xff   : > { %v424_v47 = vpack.c.bf16 %v402_v45, %v401_v44 }
 0x101   : > { %718 = vmatprep.mubr.bf16.mxu1 %v424_v47 }
 0x102   : > { %719 = vmatmul.mubr.bf16.gmra.mxu1 %v425_v48 }
 0x1ba   : > { %v716_v49 = vpop.f32.mrf.mxu1 }
 0x1bb   : > { %v523_v55 = vadd.f32 %v716_v49, %v639_v51 }
 0x1bc   : > { %v514_v50 = vpop.f32.mrf.mxu1 }
 0x1bd   : > { %v515_v53 = vadd.f32 %v639_v51, %v514_v50  ;;  %v547_v61 = vmax.f32 %v523_v55, 0.0 }
 0x1be   : > { %v717_v52 = vpop.f32.mrf.mxu1 }
 0x1bf   : > { %v545_v57 = vmax.f32 %v515_v53, 0.0  ;;  %v526_v59 = vadd.f32 %v717_v52, %v639_v51 }
 0x1c0   : > { %v517_v54 = vpop.f32.mrf.mxu1 }
 0x1c1   : > { %v518_v58 = vadd.f32 %v639_v51, %v517_v54  ;;  %v553_v1 = vmax.f32 %v545_v57, %v547_v61  ;;  %v548_v4 = vmax.f32 %v526_v59, 0.0 }
 0x1c2   : > { %v720_v56 = vpop.f32.mrf.mxu1 }
 0x1c3   : > { %v539_v62 = vadd.f32 %v720_v56, %v639_v51  ;;  %v546_v2 = vmax.f32 %v518_v58, 0.0 }
 0x1c4   : > { %v530_v60 = vpop.f32.mrf.mxu1 }
 0x1c5   : > { %v531_v63 = vadd.f32 %v639_v51, %v530_v60  ;;  %v551_v6 = vmax.f32 %v539_v62, 0.0  ;;  %v554_v10 = vmax.f32 %v546_v2, %v548_v4 }
 0x1c6   : > { %v721_v0 = vpop.f32.mrf.mxu1 }
 0x1c7   : > { %v549_v3 = vmax.f32 %v531_v63, 0.0  ;;  %v542_v8 = vadd.f32 %v721_v0, %v639_v51 }
 0x1c8   : > { %v533_v5 = vpop.f32.mrf.mxu1 }
 0x1c9   : > { %v555_v7 = vmax.f32 %v553_v1, %v549_v3  ;;  %v534_v9 = vadd.f32 %v639_v51, %v533_v5  ;;  %v552_v13 = vmax.f32 %v542_v8, 0.0 }
 0x1cb   : > { %v557_v11 = vmax.f32 %v555_v7, %v551_v6  ;;  %v550_v12 = vmax.f32 %v534_v9, 0.0 }
 0x1cd   : > { %559 = vst [vmem:[%s226_s16] sm:$0xff] %v557_v11  ;;  %v556_v14 = vmax.f32 %v554_v10, %v550_v12 }
 0x1cf   : > { %v558_v15 = vmax.f32 %v556_v14, %v552_v13 }
 0x1d1   : > { %560 = vst [vmem:[%s226_s16 + $0x8] sm:$0xff] %v558_v15 }
 0x1d2 PF: > { %s15_s18 = sadd.s32 1, %s756_s18  }
 0x1d3   : > { %p12_p5 = scmp.ge.s32.totalorder %s15_s18, 4  }
 0x1d5   :  { %14 = sbr.rel (!%p12_p5) target bundleno = 1 (0x1), region = 70 }

// kernel: _lambda_.5
= control target key start
LH: loop header
LB: loop body
LE: loop exit
PB: predicated region body
PF: predicated region fallthrough
CT: control target
= control target key end

     0   :  { %s755_s0 = inlined_call_operand.vmem [shape: bf16[32,128], index: 0, kind: input, shape index: {}]   ;;  %s756_s1 = inlined_call_operand.vmem [shape: bf16[128,128], index: 1, kind: input, shape index: {}]   ;;  %s757_s2 = inlined_call_operand.vmem [shape: f32[1,128], index: 2, kind: input, shape index: {}]   ;;  %s758_s3 = inlined_call_operand.vmem [shape: bf16[128,128], index: 3, kind: input, shape index: {}]   ;;  %s759_s4 = inlined_call_operand.vmem [shape: f32[1,128], index: 4, kind: input, shape index: {}]   ;;  %s760_s5 = inlined_call_operand.vmem [shape: f32[128,128], index: 5, kind: input, shape index: {}]   ;;  %s761_s6 = inlined_call_operand.vmem [shape: f32[1,128], index: 6, kind: input, shape index: {}]   ;;  %s762_s7 = inlined_call_operand.hbm [shape: f32[8,128], index: 7, kind: output, shape index: {}]  }
   0x1   :  { %v541_v0 = vld [vmem:[%s756_s1 + $0x38] sm:$0xff]   ;;  %v542_v1 = vld [vmem:[%s756_s1 + $0x30] sm:$0xff]   ;;  %v543_v2 = vld [vmem:[%s756_s1 + $0x28] sm:$0xff]  }
   0x2   :  { %463 = vmatprep.subr.bf16.mxu0 %v541_v0  ;;  %v544_v3 = vld [vmem:[%s756_s1 + $0x20] sm:$0xff]   ;;  %v551_v5 = vld [vmem:[%s758_s3 + $0x38] sm:$0xff]   ;;  %v552_v6 = vld [vmem:[%s758_s3 + $0x30] sm:$0xff]  }
   0x3   :  { %464 = vmatpush3.bf16.msra.mxu0 %v541_v0  ;;  %v549_v4 = vld [vmem:[%s755_s0] sm:$0xff]   ;;  %v545_v7 = vld [vmem:[%s756_s1 + $0x18] sm:$0xff]   ;;  %483 = vmatprep.subr.bf16.mxu1 %v551_v5  ;;  %v546_v8 = vld [vmem:[%s756_s1 + $0x10] sm:$0xff]  }
   0x4   :  { %465 = vmatprep.subr.bf16.mxu0 %v542_v1  ;;  %479 = vmatprep.mubr.bf16.mxu0 %v549_v4  ;;  %v553_v9 = vld [vmem:[%s758_s3 + $0x28] sm:$0xff]  }
   0x5   :  { %484 = vmatpush3.bf16.msra.mxu1 %v551_v5 }
   0x6   :  { %485 = vmatprep.subr.bf16.mxu1 %v552_v6 }
   0x7   :  { %466 = vmatpush3.bf16.msra.mxu0 %v542_v1 }
   0x8   :  { %467 = vmatprep.subr.bf16.mxu0 %v543_v2 }
   0x9   :  { %486 = vmatpush3.bf16.msra.mxu1 %v552_v6 }
   0xb   :  { %468 = vmatpush3.bf16.msra.mxu0 %v543_v2 }
   0xc   :  { %469 = vmatprep.subr.bf16.mxu0 %v544_v3 }
   0xf   :  { %470 = vmatpush3.bf16.msra.mxu0 %v544_v3 }
  0x10   :  { %471 = vmatprep.subr.bf16.mxu0 %v545_v7 }
  0x11   :  { %12 = vsyncpa [#allocation3], 0  ;;  %487 = vmatprep.subr.bf16.mxu1 %v553_v9  ;;  %v554_v10 = vld [vmem:[%s758_s3 + $0x20] sm:$0xff]   ;;  %v547_v11 = vld [vmem:[%s756_s1 + $0x8] sm:$0xff]   ;;  %v581_v19 = vmov 0.0   ;;  %vm582_vm0 = vmmov 0  }
  0x12   :  { %488 = vmatpush3.bf16.msra.mxu1 %v553_v9  ;;  %v555_v12 = vld [vmem:[%s758_s3 + $0x18] sm:$0xff]   ;;  %v548_v13 = vld [vmem:[%s756_s1] sm:$0xff]   ;;  %v550_v14 = vld [vmem:[%s755_s0 + $0x8] sm:$0xff]   ;;  %s583_s21 = smov [#allocation2]  }
  0x13   :  { %472 = vmatpush3.bf16.msra.mxu0 %v545_v7  ;;  %489 = vmatprep.subr.bf16.mxu1 %v554_v10  ;;  %v556_v15 = vld [vmem:[%s758_s3 + $0x10] sm:$0xff]   ;;  %v557_v16 = vld [vmem:[%s758_s3 + $0x8] sm:$0xff]   ;;  %v558_v17 = vld [vmem:[%s758_s3] sm:$0xff]  }
  0x14   :  { %473 = vmatprep.subr.bf16.mxu0 %v546_v8  ;;  %v312_v18 = vld [vmem:[%s760_s5 + $0x78] sm:$0xff]  ;;  %v311_v20 = vld [vmem:[%s760_s5 + $0x70] sm:$0xff]  ;;  %v310_v21 = vld [vmem:[%s760_s5 + $0x68] sm:$0xff] }
  0x15   :  { %v309_v22 = vld [vmem:[%s760_s5 + $0x60] sm:$0xff]  ;;  %v308_v23 = vld [vmem:[%s760_s5 + $0x58] sm:$0xff]  ;;  %v307_v24 = vld [vmem:[%s760_s5 + $0x50] sm:$0xff] }
  0x16   :  { %490 = vmatpush3.bf16.msra.mxu1 %v554_v10  ;;  %v306_v25 = vld [vmem:[%s760_s5 + $0x48] sm:$0xff]  ;;  %v405_v28 = vld [vmem:[%s757_s2] ss:$0 sm:$0xff]  ;;  %v304_v42 = vld [vmem:[%s760_s5 + $0x38] sm:$0xff] }
  0x17   :  { %474 = vmatpush3.bf16.msra.mxu0 %v546_v8  ;;  %491 = vmatprep.subr.bf16.mxu1 %v555_v12  ;;  %v305_v41 = vld [vmem:[%s760_s5 + $0x40] sm:$0xff]  ;;  %v303_v43 = vld [vmem:[%s760_s5 + $0x30] sm:$0xff]  ;;  %v302_v44 = vld [vmem:[%s760_s5 + $0x28] sm:$0xff] }
  0x18   :  { %475 = vmatprep.subr.bf16.mxu0 %v547_v11  ;;  %v301_v45 = vld [vmem:[%s760_s5 + $0x20] sm:$0xff]  ;;  %v300_v46 = vld [vmem:[%s760_s5 + $0x18] sm:$0xff]  ;;  %v299_v47 = vld [vmem:[%s760_s5 + $0x10] sm:$0xff] }
  0x19   :  { %v298_v48 = vld [vmem:[%s760_s5 + $0x8] sm:$0xff]  ;;  %v297_v49 = vld [vmem:[%s760_s5] sm:$0xff] }
  0x1a   :  { %492 = vmatpush3.bf16.msra.mxu1 %v555_v12  ;;  %v416_v52 = vld [vmem:[%s759_s4] ss:$0 sm:$0xff]  ;;  %s397_s4 = sshll.u32 %s583_s21, 4  ;;  %s398_s4 = int_to_ptr.vmem [resolvable:$true] %s397_s4 }
  0x1b   :  { %476 = vmatpush3.bf16.msra.mxu0 %v547_v11  ;;  %493 = vmatprep.subr.bf16.mxu1 %v556_v15  ;;  %v425_v2 = vld [vmem:[%s761_s6] ss:$0 sm:$0xff]  ;;  %s559_s22 = scalar_lea.vmem %s398_s4, 128  ;;  %p564_p1 = scmp.lt.s32.totalorder %s398_s4, %s398_s4 }
  0x1c   :  { %477 = vmatprep.subr.bf16.mxu0 %v548_v13  ;;  %p560_p0 = scmp.ne.s32.totalorder %s398_s4, %s559_s22  ;;  %p565_p2 = scmp.lt.s32.totalorder %s559_s22, %s559_s22 }
  0x1e   :  { %494 = vmatpush3.bf16.msra.mxu1 %v556_v15  ;;  %p566_p3 = por %p565_p2, %p564_p1 }
  0x1f   :  { %478 = vmatpush3.bf16.msra.mxu0 %v548_v13  ;;  %495 = vmatprep.subr.bf16.mxu1 %v557_v16 }
  0x20   :  { %503 = vmatprep.subr.mxu0 %v581_v19  ;;  %p567_p4 = pnand %p566_p3, %p560_p0 }
  0x22   :  { %480 = vmatmul.mubr.bf16.vlgmr.msra.gmra.mxu0 %v550_v14  ;;  %496 = vmatpush3.bf16.msra.mxu1 %v557_v16 }
  0x23   :  { %497 = vmatprep.subr.bf16.mxu1 %v558_v17  ;;  %504 = vmatpush3.msra.mxu0 %v312_v18 }
  0x24   :  { %505 = vmatprep.subr.mxu0 %v581_v19  ;;  %535 = vmatprep.mubr.msk.f32.mxu0 %vm582_vm0, %v581_v19 }
  0x25   :  { %506 = vmatpush3.msra.mxu0 %v311_v20 }
  0x26   :  { %498 = vmatpush3.bf16.msra.mxu1 %v558_v17  ;;  %507 = vmatprep.subr.mxu0 %v581_v19 }
  0x27   :  { %508 = vmatpush3.msra.mxu0 %v310_v21 }
  0x28   :  { %509 = vmatprep.subr.mxu0 %v581_v19 }
  0x29   :  { %510 = vmatpush3.msra.mxu0 %v309_v22 }
  0x2a   :  { %511 = vmatprep.subr.mxu0 %v581_v19 }
  0x2b   :  { %512 = vmatpush3.msra.mxu0 %v308_v23 }
  0x2c   :  { %513 = vmatprep.subr.mxu0 %v581_v19 }
  0x2d   :  { %514 = vmatpush3.msra.mxu0 %v307_v24 }
  0x2e   :  { %515 = vmatprep.subr.mxu0 %v581_v19 }
  0x2f   :  { %516 = vmatpush3.msra.mxu0 %v306_v25 }
  0x30   :  { %517 = vmatprep.subr.mxu0 %v581_v19 }
  0x31   :  { %518 = vmatpush3.msra.mxu0 %v305_v41 }
  0x32   :  { %519 = vmatprep.subr.mxu0 %v581_v19 }
  0x33   :  { %520 = vmatpush3.msra.mxu0 %v304_v42 }
  0x34   :  { %521 = vmatprep.subr.mxu0 %v581_v19 }
  0x35   :  { %522 = vmatpush3.msra.mxu0 %v303_v43 }
  0x36   :  { %523 = vmatprep.subr.mxu0 %v581_v19 }
  0x37   :  { %524 = vmatpush3.msra.mxu0 %v302_v44 }
  0x38   :  { %525 = vmatprep.subr.mxu0 %v581_v19 }
  0x39   :  { %526 = vmatpush3.msra.mxu0 %v301_v45 }
  0x3a   :  { %527 = vmatprep.subr.mxu0 %v581_v19 }
  0x3b   :  { %528 = vmatpush3.msra.mxu0 %v300_v46 }
  0x3c   :  { %529 = vmatprep.subr.mxu0 %v581_v19 }
  0x3d   :  { %530 = vmatpush3.msra.mxu0 %v299_v47 }
  0x3e   :  { %531 = vmatprep.subr.mxu0 %v581_v19 }
  0x3f   :  { %532 = vmatpush3.msra.mxu0 %v298_v48 }
  0x40   :  { %533 = vmatprep.subr.mxu0 %v581_v19 }
  0x41   :  { %534 = vmatpush3.msra.mxu0 %v297_v49 }
  0xe2   :  { %v481_v26 = vpop.f32.mrf.mxu0 }
  0xe3   :  { %v158_v32 = vadd.f32 %v481_v26, %v405_v28 }
  0xe4   :  { %v149_v27 = vpop.f32.mrf.mxu0 }
  0xe5   :  { %v150_v30 = vadd.f32 %v405_v28, %v149_v27  ;;  %v166_v38 = vmax.f32 %v158_v32, 0.0 }
  0xe6   :  { %v482_v29 = vpop.f32.mrf.mxu0 }
  0xe7   :  { %v161_v31 = vadd.f32 %v482_v29, %v405_v28  ;;  %v164_v36 = vmax.f32 %v150_v30, 0.0 }
  0xe8   :  { %v152_v33 = vpop.f32.mrf.mxu0 }
  0xe9   :  { %v153_v34 = vadd.f32 %v405_v28, %v152_v33  ;;  %v167_v35 = vmax.f32 %v161_v31, 0.0 }
  0xeb   :  { %v165_v37 = vmax.f32 %v153_v34, 0.0  ;;  %v186_v40 = vpack.c.bf16 %v167_v35, %v166_v38 }
  0xed   :  { %v185_v39 = vpack.c.bf16 %v165_v37, %v164_v36 }
  0xef   :  { %499 = vmatprep.mubr.bf16.mxu1 %v185_v39 }
  0xf0   :  { %500 = vmatmul.mubr.bf16.vlgmr.msra.gmra.mxu1 %v186_v40 }
 0x1b0   :  { %v501_v50 = vpop.f32.mrf.mxu1 }
 0x1b1   :  { %v284_v56 = vadd.f32 %v501_v50, %v416_v52 }
 0x1b2   :  { %v275_v51 = vpop.f32.mrf.mxu1 }
 0x1b3   :  { %v276_v54 = vadd.f32 %v416_v52, %v275_v51  ;;  %v292_v61 = vmax.f32 %v284_v56, 0.0 }
 0x1b4   :  { %v502_v53 = vpop.f32.mrf.mxu1 }
 0x1b5   :  { %v290_v58 = vmax.f32 %v276_v54, 0.0  ;;  %v287_v59 = vadd.f32 %v502_v53, %v416_v52 }
 0x1b6   :  { %v278_v55 = vpop.f32.mrf.mxu1 }
 0x1b7   :  { %v279_v57 = vadd.f32 %v416_v52, %v278_v55  ;;  %v293_v63 = vmax.f32 %v287_v59, 0.0 }
 0x1b9   :  { %v291_v60 = vmax.f32 %v279_v57, 0.0 }
 0x1bb   :  { %v294_v62 = vmax.f32 %v290_v58, %v291_v60 }
 0x1bd   :  { %v295_v0 = vmax.f32 %v294_v62, %v292_v61 }
 0x1bf   :  { %v296_v1 = vmax.f32 %v295_v0, %v293_v63 }
 0x1c1   :  { %536 = vmatmul.mubr.f32.vlgmr.msra.gmra.mxu0 %v296_v1 }
 0x281   :  { %v386_v3 = vpop.f32.mrf.mxu0 }
 0x282   :  { %v387_v4 = vadd.f32 %v425_v2, %v386_v3 }
 0x283   :  { %v537_v5 = vpop.f32.mrf.mxu0 }
 0x284   :  { %390 = vst [vmem:[#allocation2] sm:$0xff] %v387_v4 }
 0x285   :  { %570 = shalt.err (!%p567_p4)
}
 0x286   :  { %400 = dma.vmem_to_hbm [thread:$0]  %s398_s4, 128, %s762_s7, [#allocation3]  }
 0x287   :  { %579 = dma.done.wait [#allocation3], 128  }
 0x288   :  { %580 = vsyncadd [#allocation3], 4294967168 }
 0x289   :  { %404 = vsyncpa [#allocation3], 1 }

</bundles_post_ra>
